<compile_context>
chip_gen: v7x
topology: tpu7x:2x2x1
jax: 0.10.0
libtpu: 0.0.40
codegen_flags: <defaults>
</compile_context>

<pallas_src>
import functools

import numpy as np
import jax
import jax.numpy as jnp
from jax.experimental import pallas as pl
from jax.experimental.pallas import tpu as pltpu

BN_EPS = 1e-5
LANE = 128           # TPU lane width (spatial axis is padded to a multiple)
SPATIAL_TILE = 512   # lanes (spatial positions) per grid step; sweep 256-1024
HID_SLAB = 128       # hidden-dim slab size inside the kernel


def _round_up(x, m):
    return (x + m - 1) // m * m


# ------------------------------- Pallas kernel -------------------------------

def _ffn_kernel(x_ref, w1_ref, b1_ref, w2_ref, b2_ref, o_ref, *, n_slabs):
    """Fused fc1 + BN1 + ReLU + fc2 + BN2 + residual on one (C, ts) NCHW tile.

    x_ref : (C, ts)      f32   activation tile (channels on sublanes, spatial on lanes)
    w1_ref: (hidden, C)  bf16  fc1 weight with BN1 scale folded in
    b1_ref: (hidden, 1)  f32   folded BN1 shift
    w2_ref: (C, hidden)  bf16  fc2 weight with BN2 scale folded in
    b2_ref: (C, 1)       f32   folded BN2 shift
    o_ref : (C, ts)      bf16  output tile
    """
    x_f32 = x_ref[...]                             # full-precision residual source
    x_bf = x_f32.astype(jnp.bfloat16)              # MXU operand only
    hidden = w1_ref.shape[0]
    hs = hidden // n_slabs

    # Accumulator starts at residual + folded BN2 shift (saves two epilogue adds).
    acc = x_f32 + b2_ref[...]                      # (C, ts) f32

    # Slab the hidden dim: the (hs, ts) f32 activation stays near vreg-resident
    # instead of a full (hidden, ts) f32 tile spilling through VMEM.
    for s in range(n_slabs):
        lo, hi = s * hs, (s + 1) * hs
        h = jnp.dot(w1_ref[lo:hi, :], x_bf,
                    preferred_element_type=jnp.float32)      # (hs, ts) f32
        h = jnp.maximum(h + b1_ref[lo:hi, :], 0.0)           # BN1 shift + ReLU
        acc = acc + jnp.dot(w2_ref[:, lo:hi], h.astype(jnp.bfloat16),
                            preferred_element_type=jnp.float32)

    # DropPath(0.0) == identity; cast to bf16 only at the store.
    o_ref[...] = acc.astype(o_ref.dtype)


# ------------------------------ parameter folding ----------------------------

def fold_ffn_params(p):
    """Fold Conv2d bias + eval-mode BatchNorm into the weights/shifts.

    BN(conv(x)) = (scale*W) @ x + (beta + scale*(bias - mean)); the scale is
    folded straight into the bf16 weight so the kernel only adds a shift.
    Done ONCE outside the forward path.
    """
    def fold(conv_w, conv_b, gamma, beta, mean, var):
        w = conv_w[:, :, 0, 0].astype(jnp.float32)            # (cout, cin)
        scale = gamma / jnp.sqrt(var + BN_EPS)                 # (cout,)
        w_folded = (w * scale[:, None]).astype(jnp.bfloat16)   # scale folded in
        shift = (beta + scale * (conv_b - mean)).reshape(-1, 1).astype(jnp.float32)
        return w_folded, shift

    w1, b1 = fold(p["conv1_w"], p["conv1_b"], p["bn1_gamma"], p["bn1_beta"],
                  p["bn1_mean"], p["bn1_var"])
    w2, b2 = fold(p["conv2_w"], p["conv2_b"], p["bn2_gamma"], p["bn2_beta"],
                  p["bn2_mean"], p["bn2_var"])
    assert w2.shape[0] == w1.shape[1], "FFN residual requires out_features == in_features"
    return {"w1": w1, "b1": b1, "w2": w2, "b2": b2}


# --------------------------------- forward -----------------------------------

def ffn_forward(x_nchw, folded, *, spatial_tile=SPATIAL_TILE, out_dtype=jnp.bfloat16):
    """FFN forward on an NCHW tensor via one fused Pallas kernel.

    No transposes: the 1x1 convs contract over C with H*W on the lane axis, so
    NCHW is already the right layout.  Output dtype defaults to bf16 (per perf
    feedback); pass out_dtype=jnp.float32 for exact dtype parity with PyTorch.
    """
    B, C, H, W = x_nchw.shape
    w1, b1, w2, b2 = folded["w1"], folded["b1"], folded["w2"], folded["b2"]
    hidden = w1.shape[0]
    assert w1.shape == (hidden, C) and w2.shape == (C, hidden)

    S = H * W
    ts = min(spatial_tile, _round_up(S, LANE))
    s_pad = _round_up(S, ts)
    x3 = x_nchw.reshape(B, C, S)                    # free view, no data movement
    if s_pad != S:
        x3 = jnp.pad(x3, ((0, 0), (0, 0), (0, s_pad - S)))

    n_slabs = hidden // HID_SLAB if hidden % HID_SLAB == 0 else 1
    kernel = functools.partial(_ffn_kernel, n_slabs=n_slabs)

    out = pl.pallas_call(
        kernel,
        grid=(B, s_pad // ts),
        in_specs=[
            pl.BlockSpec((None, C, ts), lambda b, s: (b, 0, s)),   # x tile (f32)
            pl.BlockSpec((hidden, C), lambda b, s: (0, 0)),        # W1 (resident, bf16)
            pl.BlockSpec((hidden, 1), lambda b, s: (0, 0)),        # BN1 shift
            pl.BlockSpec((C, hidden), lambda b, s: (0, 0)),        # W2 (resident, bf16)
            pl.BlockSpec((C, 1), lambda b, s: (0, 0)),             # BN2 shift
        ],
        out_specs=pl.BlockSpec((None, C, ts), lambda b, s: (b, 0, s)),
        out_shape=jax.ShapeDtypeStruct((B, C, s_pad), out_dtype),
        compiler_params=pltpu.CompilerParams(
            dimension_semantics=("parallel", "parallel"),   # batch x spatial tiles
            vmem_limit_bytes=32 * 1024 * 1024,
        ),
    )(x3, w1, b1, w2, b2)

    if s_pad != S:
        out = out[:, :, :S]
    return out.reshape(B, C, H, W)


# ------------------------------ pure-JAX reference ---------------------------

def ffn_reference(x_nchw, p):
    """Reference FFN (bf16 matmul operands like the kernel, f32 everywhere else)."""
    B, C, H, W = x_nchw.shape
    x2 = x_nchw.reshape(B, C, H * W).astype(jnp.float32)

    def conv_bn(v, conv_w, conv_b, gamma, beta, mean, var):
        w = conv_w[:, :, 0, 0]
        scale = gamma / jnp.sqrt(var + BN_EPS)
        shift = beta + scale * (conv_b - mean)
        y = jnp.einsum("oc,bcs->bos", w.astype(jnp.bfloat16), v.astype(jnp.bfloat16),
                       preferred_element_type=jnp.float32)
        return y * scale[:, None] + shift[:, None]

    h = jnp.maximum(conv_bn(x2, p["conv1_w"], p["conv1_b"], p["bn1_gamma"],
                            p["bn1_beta"], p["bn1_mean"], p["bn1_var"]), 0.0)
    y = conv_bn(h, p["conv2_w"], p["conv2_b"], p["bn2_gamma"],
                p["bn2_beta"], p["bn2_mean"], p["bn2_var"])
    out = y + x2
    return out.reshape(B, C, H, W)


# ----------------------------------- main -------------------------------------

if __name__ == "__main__":
    key = jax.random.PRNGKey(0)
    ks = jax.random.split(key, 13)

    # FFN(in_features=128, hidden_features=4*128, drop_path=0.0) on a
    # (2, 128, 16, 16) NCHW activation: S = H*W = 256 spatial lanes per batch.
    B, C, H, W = 2, 128, 16, 16
    hidden = 4 * C

    x = jax.random.normal(ks[0], (B, C, H, W), jnp.float32)
    params = {
        "conv1_w": jax.random.normal(ks[1], (hidden, C, 1, 1), jnp.float32) / np.sqrt(C),
        "conv1_b": 0.02 * jax.random.normal(ks[2], (hidden,), jnp.float32),
        "bn1_gamma": 1.0 + 0.1 * jax.random.normal(ks[3], (hidden,), jnp.float32),
        "bn1_beta": 0.1 * jax.random.normal(ks[4], (hidden,), jnp.float32),
        "bn1_mean": 0.1 * jax.random.normal(ks[5], (hidden,), jnp.float32),
        "bn1_var": jax.random.uniform(ks[6], (hidden,), jnp.float32, 0.5, 1.5),
        "conv2_w": jax.random.normal(ks[7], (C, hidden, 1, 1), jnp.float32) / np.sqrt(hidden),
        "conv2_b": 0.02 * jax.random.normal(ks[8], (C,), jnp.float32),
        "bn2_gamma": 1.0 + 0.1 * jax.random.normal(ks[9], (C,), jnp.float32),
        "bn2_beta": 0.1 * jax.random.normal(ks[10], (C,), jnp.float32),
        "bn2_mean": 0.1 * jax.random.normal(ks[11], (C,), jnp.float32),
        "bn2_var": jax.random.uniform(ks[12], (C,), jnp.float32, 0.5, 1.5),
    }
    # TODO(synk): DropPath with drop_path > 0 is training-time stochastic depth
    # (random per-sample residual drop); with drop_path=0.0 / eval it is identity.

    folded = fold_ffn_params(params)       # BN fold into bf16 weights, hoisted (once)
    ffn = jax.jit(ffn_forward)

    out = ffn(x, folded)
    jax.block_until_ready(out)

    ref = ffn_reference(x, params)
    np.testing.assert_allclose(np.asarray(out.astype(jnp.float32)), np.asarray(ref),
                               rtol=2e-2, atol=2e-2)
    assert out.shape == (B, C, H, W)
    print("KERNEL_OK")
</pallas_src>

<mosaic_0001>
module attributes {stable_mosaic.version = 11 : i64} {
  func.func @_ffn_kernel(%arg0: i32, %arg1: i32, %arg2: memref<1x128x256xf32, #tpu.memory_space<vmem>>, %arg3: memref<512x128xbf16, #tpu.memory_space<vmem>>, %arg4: memref<512x1xf32, #tpu.memory_space<vmem>>, %arg5: memref<128x512xbf16, #tpu.memory_space<vmem>>, %arg6: memref<128x1xf32, #tpu.memory_space<vmem>>, %arg7: memref<1x128x256xbf16, #tpu.memory_space<vmem>>) attributes {dimension_semantics = [#tpu.dimension_semantics<parallel>, #tpu.dimension_semantics<parallel>], iteration_bounds = array<i64: 2, 1>, scalar_prefetch = 0 : i64, scratch_operands = 0 : i64, tpu.core_type = #tpu.core_type<tc>, window_params = [{transform_indices = @transform_0, window_bounds = array<i64: 1, 128, 256>}, {pipeline_mode = #tpu.pipeline_mode<synchronous>, transform_indices = @transform_1, window_bounds = array<i64: 512, 128>}, {pipeline_mode = #tpu.pipeline_mode<synchronous>, transform_indices = @transform_2, window_bounds = array<i64: 512, 1>}, {pipeline_mode = #tpu.pipeline_mode<synchronous>, transform_indices = @transform_3, window_bounds = array<i64: 128, 512>}, {pipeline_mode = #tpu.pipeline_mode<synchronous>, transform_indices = @transform_4, window_bounds = array<i64: 128, 1>}, {transform_indices = @transform_5, window_bounds = array<i64: 1, 128, 256>}]} {
    %c0 = arith.constant 0 : index
    %c0_0 = arith.constant 0 : index
    %c0_1 = arith.constant 0 : index
    %0 = vector.load %arg2[%c0, %c0_0, %c0_1] : memref<1x128x256xf32, #tpu.memory_space<vmem>>, vector<1x128x256xf32>
    %1 = vector.shape_cast %0 : vector<1x128x256xf32> to vector<128x256xf32>
    %2 = arith.truncf %1 : vector<128x256xf32> to vector<128x256xbf16>
    %c0_2 = arith.constant 0 : index
    %c0_3 = arith.constant 0 : index
    %3 = vector.load %arg6[%c0_2, %c0_3] : memref<128x1xf32, #tpu.memory_space<vmem>>, vector<128x1xf32>
    %4 = vector.broadcast %3 : vector<128x1xf32> to vector<128x256xf32>
    %5 = arith.addf %1, %4 : vector<128x256xf32>
    %c0_4 = arith.constant 0 : index
    %c0_5 = arith.constant 0 : index
    %6 = vector.load %arg3[%c0_4, %c0_5] : memref<512x128xbf16, #tpu.memory_space<vmem>>, vector<128x128xbf16>
    %cst = arith.constant dense<0.000000e+00> : vector<128x256xf32>
    %7 = tpu.matmul %6, %2, %cst {dimension_numbers = #tpu.dot_dimension_numbers<[1], [0], [0], [1], [0, 0, 1, 1], [], []>} : vector<128x128xbf16>, vector<128x256xbf16>, vector<128x256xf32> -> vector<128x256xf32>
    %c0_6 = arith.constant 0 : index
    %c0_7 = arith.constant 0 : index
    %8 = vector.load %arg4[%c0_6, %c0_7] : memref<512x1xf32, #tpu.memory_space<vmem>>, vector<128x1xf32>
    %9 = vector.broadcast %8 : vector<128x1xf32> to vector<128x256xf32>
    %10 = arith.addf %7, %9 : vector<128x256xf32>
    %cst_8 = arith.constant 0.000000e+00 : f32
    %11 = vector.broadcast %cst_8 : f32 to vector<128x256xf32>
    %12 = arith.maximumf %10, %11 : vector<128x256xf32>
    %c0_9 = arith.constant 0 : index
    %c0_10 = arith.constant 0 : index
    %13 = vector.load %arg5[%c0_9, %c0_10] : memref<128x512xbf16, #tpu.memory_space<vmem>>, vector<128x128xbf16>
    %14 = arith.truncf %12 : vector<128x256xf32> to vector<128x256xbf16>
    %cst_11 = arith.constant dense<0.000000e+00> : vector<128x256xf32>
    %15 = tpu.matmul %13, %14, %cst_11 {dimension_numbers = #tpu.dot_dimension_numbers<[1], [0], [0], [1], [0, 0, 1, 1], [], []>} : vector<128x128xbf16>, vector<128x256xbf16>, vector<128x256xf32> -> vector<128x256xf32>
    %16 = arith.addf %5, %15 : vector<128x256xf32>
    %c128 = arith.constant 128 : index
    %c0_12 = arith.constant 0 : index
    %17 = vector.load %arg3[%c128, %c0_12] : memref<512x128xbf16, #tpu.memory_space<vmem>>, vector<128x128xbf16>
    %cst_13 = arith.constant dense<0.000000e+00> : vector<128x256xf32>
    %18 = tpu.matmul %17, %2, %cst_13 {dimension_numbers = #tpu.dot_dimension_numbers<[1], [0], [0], [1], [0, 0, 1, 1], [], []>} : vector<128x128xbf16>, vector<128x256xbf16>, vector<128x256xf32> -> vector<128x256xf32>
    %c128_14 = arith.constant 128 : index
    %c0_15 = arith.constant 0 : index
    %19 = vector.load %arg4[%c128_14, %c0_15] : memref<512x1xf32, #tpu.memory_space<vmem>>, vector<128x1xf32>
    %20 = vector.broadcast %19 : vector<128x1xf32> to vector<128x256xf32>
    %21 = arith.addf %18, %20 : vector<128x256xf32>
    %cst_16 = arith.constant 0.000000e+00 : f32
    %22 = vector.broadcast %cst_16 : f32 to vector<128x256xf32>
    %23 = arith.maximumf %21, %22 : vector<128x256xf32>
    %c0_17 = arith.constant 0 : index
    %c128_18 = arith.constant 128 : index
    %24 = vector.load %arg5[%c0_17, %c128_18] : memref<128x512xbf16, #tpu.memory_space<vmem>>, vector<128x128xbf16>
    %25 = arith.truncf %23 : vector<128x256xf32> to vector<128x256xbf16>
    %cst_19 = arith.constant dense<0.000000e+00> : vector<128x256xf32>
    %26 = tpu.matmul %24, %25, %cst_19 {dimension_numbers = #tpu.dot_dimension_numbers<[1], [0], [0], [1], [0, 0, 1, 1], [], []>} : vector<128x128xbf16>, vector<128x256xbf16>, vector<128x256xf32> -> vector<128x256xf32>
    %27 = arith.addf %16, %26 : vector<128x256xf32>
    %c256 = arith.constant 256 : index
    %c0_20 = arith.constant 0 : index
    %28 = vector.load %arg3[%c256, %c0_20] : memref<512x128xbf16, #tpu.memory_space<vmem>>, vector<128x128xbf16>
    %cst_21 = arith.constant dense<0.000000e+00> : vector<128x256xf32>
    %29 = tpu.matmul %28, %2, %cst_21 {dimension_numbers = #tpu.dot_dimension_numbers<[1], [0], [0], [1], [0, 0, 1, 1], [], []>} : vector<128x128xbf16>, vector<128x256xbf16>, vector<128x256xf32> -> vector<128x256xf32>
    %c256_22 = arith.constant 256 : index
    %c0_23 = arith.constant 0 : index
    %30 = vector.load %arg4[%c256_22, %c0_23] : memref<512x1xf32, #tpu.memory_space<vmem>>, vector<128x1xf32>
    %31 = vector.broadcast %30 : vector<128x1xf32> to vector<128x256xf32>
    %32 = arith.addf %29, %31 : vector<128x256xf32>
    %cst_24 = arith.constant 0.000000e+00 : f32
    %33 = vector.broadcast %cst_24 : f32 to vector<128x256xf32>
    %34 = arith.maximumf %32, %33 : vector<128x256xf32>
    %c0_25 = arith.constant 0 : index
    %c256_26 = arith.constant 256 : index
    %35 = vector.load %arg5[%c0_25, %c256_26] : memref<128x512xbf16, #tpu.memory_space<vmem>>, vector<128x128xbf16>
    %36 = arith.truncf %34 : vector<128x256xf32> to vector<128x256xbf16>
    %cst_27 = arith.constant dense<0.000000e+00> : vector<128x256xf32>
    %37 = tpu.matmul %35, %36, %cst_27 {dimension_numbers = #tpu.dot_dimension_numbers<[1], [0], [0], [1], [0, 0, 1, 1], [], []>} : vector<128x128xbf16>, vector<128x256xbf16>, vector<128x256xf32> -> vector<128x256xf32>
    %38 = arith.addf %27, %37 : vector<128x256xf32>
    %c384 = arith.constant 384 : index
    %c0_28 = arith.constant 0 : index
    %39 = vector.load %arg3[%c384, %c0_28] : memref<512x128xbf16, #tpu.memory_space<vmem>>, vector<128x128xbf16>
    %cst_29 = arith.constant dense<0.000000e+00> : vector<128x256xf32>
    %40 = tpu.matmul %39, %2, %cst_29 {dimension_numbers = #tpu.dot_dimension_numbers<[1], [0], [0], [1], [0, 0, 1, 1], [], []>} : vector<128x128xbf16>, vector<128x256xbf16>, vector<128x256xf32> -> vector<128x256xf32>
    %c384_30 = arith.constant 384 : index
    %c0_31 = arith.constant 0 : index
    %41 = vector.load %arg4[%c384_30, %c0_31] : memref<512x1xf32, #tpu.memory_space<vmem>>, vector<128x1xf32>
    %42 = vector.broadcast %41 : vector<128x1xf32> to vector<128x256xf32>
    %43 = arith.addf %40, %42 : vector<128x256xf32>
    %cst_32 = arith.constant 0.000000e+00 : f32
    %44 = vector.broadcast %cst_32 : f32 to vector<128x256xf32>
    %45 = arith.maximumf %43, %44 : vector<128x256xf32>
    %c0_33 = arith.constant 0 : index
    %c384_34 = arith.constant 384 : index
    %46 = vector.load %arg5[%c0_33, %c384_34] : memref<128x512xbf16, #tpu.memory_space<vmem>>, vector<128x128xbf16>
    %47 = arith.truncf %45 : vector<128x256xf32> to vector<128x256xbf16>
    %cst_35 = arith.constant dense<0.000000e+00> : vector<128x256xf32>
    %48 = tpu.matmul %46, %47, %cst_35 {dimension_numbers = #tpu.dot_dimension_numbers<[1], [0], [0], [1], [0, 0, 1, 1], [], []>} : vector<128x128xbf16>, vector<128x256xbf16>, vector<128x256xf32> -> vector<128x256xf32>
    %49 = arith.addf %38, %48 : vector<128x256xf32>
    %50 = arith.truncf %49 : vector<128x256xf32> to vector<128x256xbf16>
    %c0_36 = arith.constant 0 : index
    %c0_37 = arith.constant 0 : index
    %c0_38 = arith.constant 0 : index
    %51 = vector.load %arg7[%c0_36, %c0_37, %c0_38] : memref<1x128x256xbf16, #tpu.memory_space<vmem>>, vector<1x128x256xbf16>
    %52 = vector.shape_cast %51 : vector<1x128x256xbf16> to vector<128x256xbf16>
    %53 = vector.shape_cast %50 : vector<128x256xbf16> to vector<1x128x256xbf16>
    tpu.vector_store %arg7[%c0_36, %c0_37, %c0_38], %53 {strides = array<i32>} : memref<1x128x256xbf16, #tpu.memory_space<vmem>>, vector<1x128x256xbf16>,
    return
  }
  func.func @transform_0(%arg0: i32, %arg1: i32) -> (i32, i32, i32) {
    %c0_i32 = arith.constant 0 : i32
    %c0_i32_0 = arith.constant 0 : i32
    return %arg0, %c0_i32, %arg1 : i32, i32, i32
  }
  func.func @transform_1(%arg0: i32, %arg1: i32) -> (i32, i32) {
    %c0_i32 = arith.constant 0 : i32
    %c0_i32_0 = arith.constant 0 : i32
    %c0_i32_1 = arith.constant 0 : i32
    return %c0_i32, %c0_i32_0 : i32, i32
  }
  func.func @transform_2(%arg0: i32, %arg1: i32) -> (i32, i32) {
    %c0_i32 = arith.constant 0 : i32
    %c0_i32_0 = arith.constant 0 : i32
    %c0_i32_1 = arith.constant 0 : i32
    return %c0_i32, %c0_i32_0 : i32, i32
  }
  func.func @transform_3(%arg0: i32, %arg1: i32) -> (i32, i32) {
    %c0_i32 = arith.constant 0 : i32
    %c0_i32_0 = arith.constant 0 : i32
    %c0_i32_1 = arith.constant 0 : i32
    return %c0_i32, %c0_i32_0 : i32, i32
  }
  func.func @transform_4(%arg0: i32, %arg1: i32) -> (i32, i32) {
    %c0_i32 = arith.constant 0 : i32
    %c0_i32_0 = arith.constant 0 : i32
    %c0_i32_1 = arith.constant 0 : i32
    return %c0_i32, %c0_i32_0 : i32, i32
  }
  func.func @transform_5(%arg0: i32, %arg1: i32) -> (i32, i32, i32) {
    %c0_i32 = arith.constant 0 : i32
    %c0_i32_0 = arith.constant 0 : i32
    return %arg0, %c0_i32, %arg1 : i32, i32, i32
  }
}

</mosaic_0001>

<bundles_post_ra>
// kernel: ffn_forward.1
= control target key start
LH: loop header
LB: loop body
LE: loop exit
PB: predicated region body
PF: predicated region fallthrough
CT: control target
= control target key end

     0   :  { %s3175_s18 = smov 0   ;;  %s3177_s19 = smov 0   ;;  %s3890_s0 = inlined_call_operand.vmem [shape: f32[2,128,256], index: 0, kind: input, shape index: {}]   ;;  %s3891_s1 = inlined_call_operand.vmem [shape: bf16[512,128], index: 1, kind: input, shape index: {}]   ;;  %s3892_s2 = inlined_call_operand.vmem [shape: f32[512,1], index: 2, kind: input, shape index: {}]   ;;  %s3893_s3 = inlined_call_operand.vmem [shape: bf16[128,512], index: 3, kind: input, shape index: {}]   ;;  %s3894_s4 = inlined_call_operand.vmem [shape: f32[128,1], index: 4, kind: input, shape index: {}]   ;;  %s3895_s5 = inlined_call_operand.vmem [shape: bf16[2,128,256], index: 5, kind: output, shape index: {}]  }
   0x1   :  { %s3179_s20 = smov 0  }
   0x2 LB: > { %s27_s21 = sadd.s32 1, %s3138_s19  ;;  %p2764_p0 = scmp.ge.s32.totalorder %s3142_s20, 1  ;;  %s3142_s20 = sphi %s3179_s20, %s15_s20   ;;  %s3138_s19 = sphi %s3177_s19, %s3897_s19   ;;  %s3134_s18 = sphi %s3175_s18, %s3896_s18  }
   0x3   : > { %p29_p1 = scmp.ge.s32.totalorder %s27_s21, 2  ;;  %p208_p2 = scmp.lt.s32.totalorder %s3142_s20, 3 }
   0x5   : > { %s3899_s21 = smov (%p29_p1, %s27_s21), 0  ;;  %p209_p3 = pnand %p2764_p0, %p208_p2 }
   0x6   : > { %v457_v0 = vld [vmem:[%s3892_s2] sm:$0xff] (!%p209_p3)  ;;  %v459_v1 = vld [vmem:[%s3892_s2 + $0x10] sm:$0xff] (!%p209_p3)  ;;  %p245_p4 = scmp.lt.s32.totalorder (!%p209_p3), %s3134_s18, 1  ;;  %v3144_v2 = vmov (!%p209_p3), 0   ;;  %v458_v3 = vld [vmem:[%s3892_s2 + $0x8] sm:$0xff] (!%p209_p3) }
   0x7   : > { %212 = sbr.rel (%p209_p3) target bundleno = 801 (0x321), region = 40  ;;  %3022 = vset.pattern.permute.xlu0 (!%p209_p3), %v3144_v2  ;;  %3023 = vset.pattern.permute.xlu1 (!%p209_p3), %v3144_v2  ;;  %v460_v4 = vld [vmem:[%s3892_s2 + $0x18] sm:$0xff] (!%p209_p3)  ;;  %v461_v5 = vld [vmem:[%s3892_s2 + $0x20] sm:$0xff] (!%p209_p3)  ;;  %v462_v9 = vld [vmem:[%s3892_s2 + $0x28] sm:$0xff] (!%p209_p3) }
   0x8   : > { %475 = vperm.xlu0 (!%p209_p3), %3022, %v457_v0   ;;  %485 = vperm.xlu1 (!%p209_p3), %3023, %v459_v1   ;;  %v463_v21 = vld [vmem:[%s3892_s2 + $0x30] sm:$0xff] (!%p209_p3)  ;;  %v464_v25 = vld [vmem:[%s3892_s2 + $0x38] sm:$0xff] (!%p209_p3)  ;;  %v465_v29 = vld [vmem:[%s3892_s2 + $0x40] sm:$0xff] (!%p209_p3) }
   0x9   : > { %633 = vmatprep.mubr.bf16.mxu0 (!%p209_p3), %v3144_v2  ;;  %858 = vmatprep.mubr.bf16.mxu1 (!%p209_p3), %v3144_v2  ;;  %v466_v33 = vld [vmem:[%s3892_s2 + $0x48] sm:$0xff] (!%p209_p3)  ;;  %v467_v36 = vld [vmem:[%s3892_s2 + $0x50] sm:$0xff] (!%p209_p3)  ;;  %v468_v38 = vld [vmem:[%s3892_s2 + $0x58] sm:$0xff] (!%p209_p3) }
   0xa   : > { %v469_v44 = vld [vmem:[%s3892_s2 + $0x60] sm:$0xff] (!%p209_p3)  ;;  %v470_v46 = vld [vmem:[%s3892_s2 + $0x68] sm:$0xff] (!%p209_p3)  ;;  %v471_v52 = vld [vmem:[%s3892_s2 + $0x70] sm:$0xff] (!%p209_p3) }
   0xb   : > { %v472_v57 = vld [vmem:[%s3892_s2 + $0x78] sm:$0xff] (!%p209_p3)  ;;  %v987_v60 = vld [vmem:[%s3892_s2 + $0x80] sm:$0xff] (!%p209_p3)  ;;  %v988_v1 = vld [vmem:[%s3892_s2 + $0x88] sm:$0xff] (!%p209_p3) }
   0xc   : > { %480 = vperm.xlu0 (!%p209_p3), %3022, %v458_v3   ;;  %490 = vperm.xlu1 (!%p209_p3), %3023, %v460_v4   ;;  %v989_v4 = vld [vmem:[%s3892_s2 + $0x90] sm:$0xff] (!%p209_p3) }
   0xe   : > { %s3901_s18 = smov (!%p245_p4, %s3134_s18), 1 }
   0xf   : > { %s2851_s30 = sshll.u32 %s3901_s18, 8  ;;  %s2852_s9 = sshll.u32 %s3901_s18, 7 }
  0x10   : > { %s3215_s8 = scalar_lea.vmem %s3890_s0, %s2851_s30  ;;  %495 = vperm.xlu0 %3022, %v461_v5   ;;  %500 = vperm.xlu1 %3023, %v462_v9   ;;  %v990_v5 = vld [vmem:[%s3892_s2 + $0x98] sm:$0xff]  ;;  %v993_v9 = vld [vmem:[%s3892_s2 + $0xb0] sm:$0xff]  ;;  %s3835_s12 = scalar_lea.vmem %s3895_s5, %s2852_s9 }
  0x11   : > { %v266_v6 = vld [vmem:[%s3215_s8 + $0x8] sm:$0xff]  ;;  %v268_v7 = vld [vmem:[%s3215_s8 + $0x18] sm:$0xff]  ;;  %v265_v8 = vld [vmem:[%s3215_s8] sm:$0xff] }
  0x12   : > { %v3226_v10 = vpack.c.bf16 %v268_v7, %v266_v6  ;;  %v267_v11 = vld [vmem:[%s3215_s8 + $0x10] sm:$0xff]  ;;  %v270_v12 = vld [vmem:[%s3215_s8 + $0x28] sm:$0xff]  ;;  %v272_v13 = vld [vmem:[%s3215_s8 + $0x38] sm:$0xff] }
  0x13   : > { %v3231_v14 = vpack.c.bf16 %v267_v11, %v265_v8  ;;  %v3233_v15 = vpack.c.bf16 %v272_v13, %v270_v12  ;;  %v269_v16 = vld [vmem:[%s3215_s8 + $0x20] sm:$0xff]  ;;  %v271_v17 = vld [vmem:[%s3215_s8 + $0x30] sm:$0xff]  ;;  %v274_v18 = vld [vmem:[%s3215_s8 + $0x48] sm:$0xff] }
  0x14   : > { %601 = vmatprep.subr.bf16.mxu0 %v3226_v10  ;;  %v276_v19 = vld [vmem:[%s3215_s8 + $0x58] sm:$0xff]  ;;  %v3241_v20 = vpack.c.bf16 %v271_v17, %v269_v16  ;;  %v273_v23 = vld [vmem:[%s3215_s8 + $0x40] sm:$0xff]  ;;  %v275_v24 = vld [vmem:[%s3215_s8 + $0x50] sm:$0xff]  ;;  %505 = vperm.xlu0 %3022, %v463_v21  }
  0x15   : > { %602 = vmatpush1.bf16.msra.mxu0 %v3231_v14  ;;  %v3247_v22 = vpack.c.bf16 %v276_v19, %v274_v18  ;;  %v278_v26 = vld [vmem:[%s3215_s8 + $0x68] sm:$0xff]  ;;  %v280_v27 = vld [vmem:[%s3215_s8 + $0x78] sm:$0xff]  ;;  %v3257_v28 = vpack.c.bf16 %v275_v24, %v273_v23  ;;  %510 = vperm.xlu1 %3023, %v464_v25   ;;  %v277_v31 = vld [vmem:[%s3215_s8 + $0x60] sm:$0xff] }
  0x16   : > { %603 = vmatprep.subr.bf16.mxu0 %v3233_v15  ;;  %v3263_v30 = vpack.c.bf16 %v280_v27, %v278_v26  ;;  %v279_v32 = vld [vmem:[%s3215_s8 + $0x70] sm:$0xff]  ;;  %v282_v34 = vld [vmem:[%s3215_s8 + $0x88] sm:$0xff]  ;;  %v284_v35 = vld [vmem:[%s3215_s8 + $0x98] sm:$0xff] }
  0x17   : > { %v3276_v37 = vpack.c.bf16 %v279_v32, %v277_v31  ;;  %v3282_v39 = vpack.c.bf16 %v284_v35, %v282_v34  ;;  %v281_v40 = vld [vmem:[%s3215_s8 + $0x80] sm:$0xff]  ;;  %v283_v41 = vld [vmem:[%s3215_s8 + $0x90] sm:$0xff]  ;;  %v286_v42 = vld [vmem:[%s3215_s8 + $0xa8] sm:$0xff] }
  0x18   : > { %515 = vperm.xlu0 %3022, %v465_v29   ;;  %v288_v43 = vld [vmem:[%s3215_s8 + $0xb8] sm:$0xff]  ;;  %v3292_v45 = vpack.c.bf16 %v283_v41, %v281_v40  ;;  %v285_v48 = vld [vmem:[%s3215_s8 + $0xa0] sm:$0xff]  ;;  %v287_v49 = vld [vmem:[%s3215_s8 + $0xb0] sm:$0xff] }
  0x19   : > { %604 = vmatpush1.bf16.msra.mxu0 %v3241_v20  ;;  %520 = vperm.xlu1 %3023, %v466_v33   ;;  %v3298_v47 = vpack.c.bf16 %v288_v43, %v286_v42  ;;  %v290_v50 = vld [vmem:[%s3215_s8 + $0xc8] sm:$0xff]  ;;  %v292_v51 = vld [vmem:[%s3215_s8 + $0xd8] sm:$0xff]  ;;  %v3308_v53 = vpack.c.bf16 %v287_v49, %v285_v48  ;;  %v289_v55 = vld [vmem:[%s3215_s8 + $0xc0] sm:$0xff] }
  0x1a   : > { %605 = vmatprep.subr.bf16.mxu0 %v3247_v22  ;;  %v3311_v54 = vpack.c.bf16 %v292_v51, %v290_v50  ;;  %v291_v56 = vld [vmem:[%s3215_s8 + $0xd0] sm:$0xff]  ;;  %v294_v58 = vld [vmem:[%s3215_s8 + $0xe8] sm:$0xff]  ;;  %v296_v59 = vld [vmem:[%s3215_s8 + $0xf8] sm:$0xff] }
  0x1b   : > { %v3324_v61 = vpack.c.bf16 %v291_v56, %v289_v55  ;;  %v293_v62 = vld [vmem:[%s3215_s8 + $0xe0] sm:$0xff]  ;;  %v3328_v63 = vpack.c.bf16 %v296_v59, %v294_v58  ;;  %v295_v0 = vld [vmem:[%s3215_s8 + $0xf0] sm:$0xff]  ;;  %v992_v8 = vld [vmem:[%s3892_s2 + $0xa8] sm:$0xff] }
  0x1c   : > { %525 = vperm.xlu0 %3022, %v467_v36   ;;  %v3335_v3 = vpack.c.bf16 %v295_v0, %v293_v62  ;;  %v3024_v6 = vld [vmem:[%s3891_s1] sm:$0xff]   ;;  %v994_v11 = vld [vmem:[%s3892_s2 + $0xb8] sm:$0xff]  ;;  %v3025_v12 = vld [vmem:[%s3891_s1 + $0x8] sm:$0xff]  }
  0x1d   : > { %606 = vmatpush1.bf16.msra.mxu0 %v3257_v28  ;;  %530 = vperm.xlu1 %3023, %v468_v38   ;;  %v991_v7 = vld [vmem:[%s3892_s2 + $0xa0] sm:$0xff]  ;;  %v996_v16 = vld [vmem:[%s3892_s2 + $0xc8] sm:$0xff]  ;;  %v997_v17 = vld [vmem:[%s3892_s2 + $0xd0] sm:$0xff] }
  0x1e   : > { %607 = vmatprep.subr.bf16.mxu0 %v3263_v30  ;;  %v995_v13 = vld [vmem:[%s3892_s2 + $0xc0] sm:$0xff]  ;;  %v998_v18 = vld [vmem:[%s3892_s2 + $0xd8] sm:$0xff]  ;;  %v3026_v19 = vld [vmem:[%s3891_s1 + $0x10] sm:$0xff]  }
  0x1f   : > { %v999_v21 = vld [vmem:[%s3892_s2 + $0xe0] sm:$0xff]  ;;  %v1000_v23 = vld [vmem:[%s3892_s2 + $0xe8] sm:$0xff]  ;;  %v1001_v24 = vld [vmem:[%s3892_s2 + $0xf0] sm:$0xff] }
  0x20   : > { %535 = vperm.xlu0 %3022, %v469_v44   ;;  %v1002_v25 = vld [vmem:[%s3892_s2 + $0xf8] sm:$0xff]  ;;  %v1517_v27 = vld [vmem:[%s3892_s2 + $0x100] sm:$0xff]  ;;  %v1518_v29 = vld [vmem:[%s3892_s2 + $0x108] sm:$0xff] }
  0x21   : > { %608 = vmatpush1.bf16.msra.mxu0 %v3276_v37  ;;  %540 = vperm.xlu1 %3023, %v470_v46   ;;  %v3027_v26 = vld [vmem:[%s3891_s1 + $0x18] sm:$0xff]   ;;  %v1519_v31 = vld [vmem:[%s3892_s2 + $0x110] sm:$0xff]  ;;  %v3028_v33 = vld [vmem:[%s3891_s1 + $0x20] sm:$0xff]  }
  0x22   : > { %609 = vmatprep.subr.bf16.mxu0 %v3282_v39  ;;  %v1520_v32 = vld [vmem:[%s3892_s2 + $0x118] sm:$0xff]  ;;  %v1521_v34 = vld [vmem:[%s3892_s2 + $0x120] sm:$0xff]  ;;  %v1522_v35 = vld [vmem:[%s3892_s2 + $0x128] sm:$0xff] }
  0x23   : > { %v1523_v36 = vld [vmem:[%s3892_s2 + $0x130] sm:$0xff]  ;;  %v1524_v38 = vld [vmem:[%s3892_s2 + $0x138] sm:$0xff]  ;;  %v3029_v40 = vld [vmem:[%s3891_s1 + $0x28] sm:$0xff]  }
  0x24   : > { %545 = vperm.xlu0 %3022, %v471_v52   ;;  %v1525_v41 = vld [vmem:[%s3892_s2 + $0x140] sm:$0xff]  ;;  %v1526_v42 = vld [vmem:[%s3892_s2 + $0x148] sm:$0xff]  ;;  %v1527_v43 = vld [vmem:[%s3892_s2 + $0x150] sm:$0xff] }
  0x25   : > { %610 = vmatpush1.bf16.msra.mxu0 %v3292_v45  ;;  %550 = vperm.xlu1 %3023, %v472_v57   ;;  %v1528_v44 = vld [vmem:[%s3892_s2 + $0x158] sm:$0xff]  ;;  %v3030_v46 = vld [vmem:[%s3891_s1 + $0x30] sm:$0xff]   ;;  %v1529_v48 = vld [vmem:[%s3892_s2 + $0x160] sm:$0xff] }
  0x26   : > { %611 = vmatprep.subr.bf16.mxu0 %v3298_v47  ;;  %v1530_v49 = vld [vmem:[%s3892_s2 + $0x168] sm:$0xff]  ;;  %v1531_v50 = vld [vmem:[%s3892_s2 + $0x170] sm:$0xff]  ;;  %v1532_v51 = vld [vmem:[%s3892_s2 + $0x178] sm:$0xff] }
  0x27   : > { %v3031_v52 = vld [vmem:[%s3891_s1 + $0x38] sm:$0xff]   ;;  %v2047_v55 = vld [vmem:[%s3892_s2 + $0x180] sm:$0xff]  ;;  %v2048_v56 = vld [vmem:[%s3892_s2 + $0x188] sm:$0xff] }
  0x28   : > { %1005 = vperm.xlu0 %3022, %v987_v60   ;;  %v2049_v57 = vld [vmem:[%s3892_s2 + $0x190] sm:$0xff]  ;;  %v2050_v58 = vld [vmem:[%s3892_s2 + $0x198] sm:$0xff]  ;;  %v3032_v59 = vld [vmem:[%s3891_s1 + $0x40] sm:$0xff]  }
  0x29   : > { %612 = vmatpush1.bf16.msra.mxu0 %v3308_v53  ;;  %1010 = vperm.xlu1 %3023, %v988_v1   ;;  %v2051_v60 = vld [vmem:[%s3892_s2 + $0x1a0] sm:$0xff]  ;;  %v2052_v62 = vld [vmem:[%s3892_s2 + $0x1a8] sm:$0xff]  ;;  %v2053_v0 = vld [vmem:[%s3892_s2 + $0x1b0] sm:$0xff] }
  0x2a   : > { %613 = vmatprep.subr.bf16.mxu0 %v3311_v54  ;;  %v2054_v1 = vld [vmem:[%s3892_s2 + $0x1b8] sm:$0xff] }
  0x2c   : > { %1015 = vperm.xlu0 %3022, %v989_v4   ;;  %v3033_v4 = vld [vmem:[%s3891_s1 + $0x48] sm:$0xff]  }
  0x2d   : > { %614 = vmatpush1.bf16.msra.mxu0 %v3324_v61  ;;  %1020 = vperm.xlu1 %3023, %v990_v5   ;;  %v2055_v5 = vld [vmem:[%s3892_s2 + $0x1c0] sm:$0xff] }
  0x2e   : > { %615 = vmatprep.subr.bf16.mxu0 %v3328_v63 }
  0x30   : > { %1025 = vperm.xlu0 %3022, %v991_v7   ;;  %v2057_v7 = vld [vmem:[%s3892_s2 + $0x1d0] sm:$0xff] }
  0x31   : > { %616 = vmatpush1.bf16.msra.mxu0 %v3335_v3  ;;  %1030 = vperm.xlu1 %3023, %v992_v8   ;;  %v2058_v8 = vld [vmem:[%s3892_s2 + $0x1d8] sm:$0xff] }
  0x32   : > { %1131 = vmatprep.subr.bf16.mxu0 %v3226_v10 }
  0x34   : > { %634 = vmatmul.mubr.bf16.vlgmr.msra.gmra.mrb[0].mxu0 %v3024_v6  ;;  %1035 = vperm.xlu0 %3022, %v993_v9   ;;  %v2056_v6 = vld [vmem:[%s3892_s2 + $0x1c8] sm:$0xff]  ;;  %v3034_v9 = vld [vmem:[%s3891_s1 + $0x50] sm:$0xff]  }
  0x35   : > { %1132 = vmatpush1.bf16.msra.mxu0 %v3231_v14  ;;  %643 = vmatprep.mubr.bf16.mxu0 %v3144_v2 }
  0x36   : > { %1133 = vmatprep.subr.bf16.mxu0 %v3233_v15  ;;  %1040 = vperm.xlu1 %3023, %v994_v11   ;;  %v2059_v11 = vld [vmem:[%s3892_s2 + $0x1e0] sm:$0xff] }
  0x38   : > { %1045 = vperm.xlu0 %3022, %v995_v13   ;;  %v2061_v13 = vld [vmem:[%s3892_s2 + $0x1f0] sm:$0xff] }
  0x39   : > { %1134 = vmatpush1.bf16.msra.mxu0 %v3241_v20 }
  0x3a   : > { %1135 = vmatprep.subr.bf16.mxu0 %v3247_v22  ;;  %1050 = vperm.xlu1 %3023, %v996_v16   ;;  %v2062_v16 = vld [vmem:[%s3892_s2 + $0x1f8] sm:$0xff] }
  0x3c   : > { %644 = vmatmul.mubr.bf16.gmra.mrb[4].mxu0 %v3025_v12  ;;  %1055 = vperm.xlu0 %3022, %v997_v17   ;;  %v2060_v12 = vld [vmem:[%s3892_s2 + $0x1e8] sm:$0xff]  ;;  %v3035_v17 = vld [vmem:[%s3891_s1 + $0x58] sm:$0xff]  }
  0x3d   : > { %653 = vmatprep.mubr.bf16.mxu0 %v3144_v2  ;;  %1136 = vmatpush1.bf16.msra.mxu0 %v3257_v28 }
  0x3e   : > { %1137 = vmatprep.subr.bf16.mxu0 %v3263_v30  ;;  %1060 = vperm.xlu1 %3023, %v998_v18   ;;  %v313_v18 = vld [vmem:[%s3894_s4] sm:$0xff] }
  0x40   : > { %1065 = vperm.xlu0 %3022, %v999_v21   ;;  %v315_v21 = vld [vmem:[%s3894_s4 + $0x10] sm:$0xff] }
  0x41   : > { %1138 = vmatpush1.bf16.msra.mxu0 %v3276_v37 }
  0x42   : > { %1139 = vmatprep.subr.bf16.mxu0 %v3282_v39  ;;  %1070 = vperm.xlu1 %3023, %v1000_v23   ;;  %v316_v23 = vld [vmem:[%s3894_s4 + $0x18] sm:$0xff] }
  0x44   : > { %654 = vmatmul.mubr.bf16.gmra.mrb[8].mxu0 %v3026_v19  ;;  %1075 = vperm.xlu0 %3022, %v1001_v24   ;;  %v314_v19 = vld [vmem:[%s3894_s4 + $0x8] sm:$0xff]  ;;  %v3036_v24 = vld [vmem:[%s3891_s1 + $0x60] sm:$0xff]  }
  0x45   : > { %663 = vmatprep.mubr.bf16.mxu0 %v3144_v2  ;;  %1140 = vmatpush1.bf16.msra.mxu0 %v3292_v45 }
  0x46   : > { %1141 = vmatprep.subr.bf16.mxu0 %v3298_v47  ;;  %1080 = vperm.xlu1 %3023, %v1002_v25   ;;  %v317_v25 = vld [vmem:[%s3894_s4 + $0x20] sm:$0xff] }
  0x48   : > { %1535 = vperm.xlu0 %3022, %v1517_v27   ;;  %v319_v27 = vld [vmem:[%s3894_s4 + $0x30] sm:$0xff] }
  0x49   : > { %1142 = vmatpush1.bf16.msra.mxu0 %v3308_v53 }
  0x4a   : > { %1143 = vmatprep.subr.bf16.mxu0 %v3311_v54  ;;  %1540 = vperm.xlu1 %3023, %v1518_v29   ;;  %v320_v29 = vld [vmem:[%s3894_s4 + $0x38] sm:$0xff] }
  0x4c   : > { %664 = vmatmul.mubr.bf16.gmra.mrb[12].mxu0 %v3027_v26  ;;  %1545 = vperm.xlu0 %3022, %v1519_v31   ;;  %v318_v26 = vld [vmem:[%s3894_s4 + $0x28] sm:$0xff] }
  0x4d   : > { %673 = vmatprep.mubr.bf16.mxu0 %v3144_v2  ;;  %1144 = vmatpush1.bf16.msra.mxu0 %v3324_v61  ;;  %v3037_v31 = vld [vmem:[%s3891_s1 + $0x68] sm:$0xff]  }
  0x4e   : > { %1145 = vmatprep.subr.bf16.mxu0 %v3328_v63  ;;  %1550 = vperm.xlu1 %3023, %v1520_v32   ;;  %v322_v32 = vld [vmem:[%s3894_s4 + $0x48] sm:$0xff] }
  0x50   : > { %1555 = vperm.xlu0 %3022, %v1521_v34   ;;  %v324_v34 = vld [vmem:[%s3894_s4 + $0x58] sm:$0xff] }
  0x51   : > { %1146 = vmatpush1.bf16.msra.mxu0 %v3335_v3 }
  0x52   : > { %1661 = vmatprep.subr.bf16.mxu0 %v3226_v10  ;;  %1560 = vperm.xlu1 %3023, %v1522_v35   ;;  %v3038_v35 = vld [vmem:[%s3891_s1 + $0x70] sm:$0xff]  }
  0x54   : > { %674 = vmatmul.mubr.bf16.gmra.mrb[16].mxu0 %v3028_v33  ;;  %1565 = vperm.xlu0 %3022, %v1523_v36   ;;  %v323_v33 = vld [vmem:[%s3894_s4 + $0x50] sm:$0xff]  ;;  %v325_v36 = vld [vmem:[%s3894_s4 + $0x60] sm:$0xff] }
  0x55   : > { %683 = vmatprep.mubr.bf16.mxu0 %v3144_v2 }
  0x56   : > { %1570 = vperm.xlu1 %3023, %v1524_v38   ;;  %v326_v38 = vld [vmem:[%s3894_s4 + $0x68] sm:$0xff] }
  0x58   : > { %1575 = vperm.xlu0 %3022, %v1525_v41   ;;  %v328_v41 = vld [vmem:[%s3894_s4 + $0x78] sm:$0xff] }
  0x5a   : > { %1580 = vperm.xlu1 %3023, %v1526_v42   ;;  %v3039_v42 = vld [vmem:[%s3891_s1 + $0x78] sm:$0xff]  }
  0x5c   : > { %684 = vmatmul.mubr.bf16.gmra.mrb[20].mxu0 %v3029_v40  ;;  %1585 = vperm.xlu0 %3022, %v1527_v43   ;;  %v327_v40 = vld [vmem:[%s3894_s4 + $0x70] sm:$0xff]  ;;  %v3040_v43 = vld [vmem:[%s3891_s1 + $0x80] sm:$0xff]  }
  0x5d   : > { %693 = vmatprep.mubr.bf16.mxu0 %v3144_v2 }
  0x5e   : > { %1590 = vperm.xlu1 %3023, %v1528_v44   ;;  %v3041_v44 = vld [vmem:[%s3891_s1 + $0x88] sm:$0xff]  }
  0x60   : > { %1595 = vperm.xlu0 %3022, %v1529_v48  }
  0x62   : > { %1600 = vperm.xlu1 %3023, %v1530_v49  }
  0x64   : > { %694 = vmatmul.mubr.bf16.gmra.mrb[24].mxu0 %v3030_v46  ;;  %1605 = vperm.xlu0 %3022, %v1531_v50  }
  0x65   : > { %703 = vmatprep.mubr.bf16.mxu0 %v3144_v2 }
  0x66   : > { %1610 = vperm.xlu1 %3023, %v1532_v51  }
  0x68   : > { %2065 = vperm.xlu0 %3022, %v2047_v55  }
  0x6a   : > { %2070 = vperm.xlu1 %3023, %v2048_v56  }
  0x6c   : > { %704 = vmatmul.mubr.bf16.gmra.mrb[28].mxu0 %v3031_v52  ;;  %2075 = vperm.xlu0 %3022, %v2049_v57  }
  0x6d   : > { %1163 = vmatprep.mubr.bf16.mxu0 %v3144_v2 }
  0x6e   : > { %2080 = vperm.xlu1 %3023, %v2050_v58  }
  0x70   : > { %2085 = vperm.xlu0 %3022, %v2051_v60  }
  0x72   : > { %2090 = vperm.xlu1 %3023, %v2052_v62  }
  0x74   : > { %1164 = vmatmul.mubr.bf16.vlgmr.msra.gmra.mrb[32].mxu0 %v3032_v59  ;;  %2095 = vperm.xlu0 %3022, %v2053_v0  }
  0x75   : > { %1662 = vmatpush1.bf16.msra.mxu0 %v3231_v14  ;;  %1173 = vmatprep.mubr.bf16.mxu0 %v3144_v2 }
  0x76   : > { %1663 = vmatprep.subr.bf16.mxu0 %v3233_v15  ;;  %2100 = vperm.xlu1 %3023, %v2054_v1  }
  0x78   : > { %2105 = vperm.xlu0 %3022, %v2055_v5  }
  0x79   : > { %1664 = vmatpush1.bf16.msra.mxu0 %v3241_v20 }
  0x7a   : > { %1665 = vmatprep.subr.bf16.mxu0 %v3247_v22  ;;  %2110 = vperm.xlu1 %3023, %v2056_v6  }
  0x7c   : > { %1174 = vmatmul.mubr.bf16.gmra.mrb[36].mxu0 %v3033_v4  ;;  %2115 = vperm.xlu0 %3022, %v2057_v7   ;;  %v3052_v4 = vld [vmem:[%s3891_s1 + $0xe0] sm:$0xff]  }
  0x7d   : > { %1183 = vmatprep.mubr.bf16.mxu0 %v3144_v2  ;;  %1666 = vmatpush1.bf16.msra.mxu0 %v3257_v28 }
  0x7e   : > { %1667 = vmatprep.subr.bf16.mxu0 %v3263_v30  ;;  %2120 = vperm.xlu1 %3023, %v2058_v8  }
  0x80   : > { %2125 = vperm.xlu0 %3022, %v2059_v11  }
  0x81   : > { %1668 = vmatpush1.bf16.msra.mxu0 %v3276_v37 }
  0x82   : > { %1669 = vmatprep.subr.bf16.mxu0 %v3282_v39  ;;  %2130 = vperm.xlu1 %3023, %v2060_v12  }
  0x84   : > { %1184 = vmatmul.mubr.bf16.gmra.mrb[40].mxu0 %v3034_v9  ;;  %2135 = vperm.xlu0 %3022, %v2061_v13  }
  0x85   : > { %1193 = vmatprep.mubr.bf16.mxu0 %v3144_v2  ;;  %1670 = vmatpush1.bf16.msra.mxu0 %v3292_v45 }
  0x86   : > { %1671 = vmatprep.subr.bf16.mxu0 %v3298_v47  ;;  %2140 = vperm.xlu1 %3023, %v2062_v16  }
  0x87   : > { %v486_v51 = vpop.permute.xlu1 %485 }
  0x88   : > { %331 = vperm.xlu0 %3022, %v313_v18  }
  0x89   : > { %1672 = vmatpush1.bf16.msra.mxu0 %v3308_v53 }
  0x8a   : > { %1673 = vmatprep.subr.bf16.mxu0 %v3311_v54  ;;  %336 = vperm.xlu1 %3023, %v314_v19  }
  0x8b   : > { %v491_v5 = vpop.permute.xlu1 %490 }
  0x8c   : > { %1194 = vmatmul.mubr.bf16.gmra.mrb[44].mxu0 %v3035_v17  ;;  %341 = vperm.xlu0 %3022, %v315_v21  }
  0x8d   : > { %1203 = vmatprep.mubr.bf16.mxu0 %v3144_v2  ;;  %1674 = vmatpush1.bf16.msra.mxu0 %v3324_v61 }
  0x8e   : > { %1675 = vmatprep.subr.bf16.mxu0 %v3328_v63  ;;  %346 = vperm.xlu1 %3023, %v316_v23  }
  0x90   : > { %351 = vperm.xlu0 %3022, %v317_v25  }
  0x91   : > { %1676 = vmatpush1.bf16.msra.mxu0 %v3335_v3 }
  0x92   : > { %2191 = vmatprep.subr.bf16.mxu0 %v3226_v10  ;;  %356 = vperm.xlu1 %3023, %v318_v26   ;;  %v321_v10 = vld [vmem:[%s3894_s4 + $0x40] sm:$0xff]  ;;  %v3053_v26 = vld [vmem:[%s3891_s1 + $0xe8] sm:$0xff]  }
  0x94   : > { %1204 = vmatmul.mubr.bf16.gmra.mrb[48].mxu0 %v3036_v24  ;;  %361 = vperm.xlu0 %3022, %v319_v27   ;;  %v501_v27 = vpop.permute.xlu1 %500 }
  0x95   : > { %1213 = vmatprep.mubr.bf16.mxu0 %v3144_v2 }
  0x96   : > { %366 = vperm.xlu1 %3023, %v320_v29  }
  0x98   : > { %371 = vperm.xlu0 %3022, %v321_v10  }
  0x9a   : > { %376 = vperm.xlu1 %3023, %v322_v32  }
  0x9c   : > { %1214 = vmatmul.mubr.bf16.gmra.mrb[52].mxu0 %v3037_v31  ;;  %381 = vperm.xlu0 %3022, %v323_v33  }
  0x9d   : > { %1223 = vmatprep.mubr.bf16.mxu0 %v3144_v2 }
  0x9e   : > { %386 = vperm.xlu1 %3023, %v324_v34  }
  0xa0   : > { %391 = vperm.xlu0 %3022, %v325_v36  }
  0xa2   : > { %396 = vperm.xlu1 %3023, %v326_v38  }
  0xa4   : > { %1224 = vmatmul.mubr.bf16.gmra.mrb[56].mxu0 %v3038_v35  ;;  %401 = vperm.xlu0 %3022, %v327_v40  }
  0xa5   : > { %1233 = vmatprep.mubr.bf16.mxu0 %v3144_v2 }
  0xa6   : > { %406 = vperm.xlu1 %3023, %v328_v41  }
  0xac   : > { %1234 = vmatmul.mubr.bf16.gmra.mrb[60].mxu0 %v3039_v42 }
  0xad   : > { %1693 = vmatprep.mubr.bf16.mxu0 %v3144_v2 }
  0xb4   : > { %1694 = vmatmul.mubr.bf16.vlgmr.msra.gmra.mrb[64].mxu0 %v3040_v43 }
  0xb5   : > { %2192 = vmatpush1.bf16.msra.mxu0 %v3231_v14  ;;  %1703 = vmatprep.mubr.bf16.mxu0 %v3144_v2  ;;  %v3042_v14 = vld [vmem:[%s3891_s1 + $0x90] sm:$0xff]  }
  0xb6   : > { %2193 = vmatprep.subr.bf16.mxu0 %v3233_v15  ;;  %v3043_v15 = vld [vmem:[%s3891_s1 + $0x98] sm:$0xff]  }
  0xb9   : > { %2194 = vmatpush1.bf16.msra.mxu0 %v3241_v20  ;;  %v3044_v20 = vld [vmem:[%s3891_s1 + $0xa0] sm:$0xff]  }
  0xba   : > { %2195 = vmatprep.subr.bf16.mxu0 %v3247_v22  ;;  %v3045_v22 = vld [vmem:[%s3891_s1 + $0xa8] sm:$0xff]  }
  0xbc   : > { %1704 = vmatmul.mubr.bf16.gmra.mrb[68].mxu0 %v3041_v44 }
  0xbd   : > { %1713 = vmatprep.mubr.bf16.mxu0 %v3144_v2  ;;  %2196 = vmatpush1.bf16.msra.mxu0 %v3257_v28  ;;  %v3046_v28 = vld [vmem:[%s3891_s1 + $0xb0] sm:$0xff]  }
  0xbe   : > { %2197 = vmatprep.subr.bf16.mxu0 %v3263_v30  ;;  %v3047_v30 = vld [vmem:[%s3891_s1 + $0xb8] sm:$0xff]  }
  0xc1   : > { %2198 = vmatpush1.bf16.msra.mxu0 %v3276_v37  ;;  %v3048_v37 = vld [vmem:[%s3891_s1 + $0xc0] sm:$0xff]  }
  0xc2   : > { %2199 = vmatprep.subr.bf16.mxu0 %v3282_v39  ;;  %v3049_v39 = vld [vmem:[%s3891_s1 + $0xc8] sm:$0xff]  }
  0xc4   : > { %1714 = vmatmul.mubr.bf16.gmra.mrb[72].mxu0 %v3042_v14 }
  0xc5   : > { %1723 = vmatprep.mubr.bf16.mxu0 %v3144_v2  ;;  %2200 = vmatpush1.bf16.msra.mxu0 %v3292_v45  ;;  %v3050_v45 = vld [vmem:[%s3891_s1 + $0xd0] sm:$0xff]  }
  0xc6   : > { %2201 = vmatprep.subr.bf16.mxu0 %v3298_v47  ;;  %v476_v47 = vpop.permute.xlu0 %475 }
  0xc9   : > { %2202 = vmatpush1.bf16.msra.mxu0 %v3308_v53 }
  0xca   : > { %2203 = vmatprep.subr.bf16.mxu0 %v3311_v54 }
  0xcc   : > { %1724 = vmatmul.mubr.bf16.gmra.mrb[76].mxu0 %v3043_v15  ;;  %v3054_v15 = vld [vmem:[%s3891_s1 + $0xf0] sm:$0xff]  }
  0xcd   : > { %1733 = vmatprep.mubr.bf16.mxu0 %v3144_v2  ;;  %2204 = vmatpush1.bf16.msra.mxu0 %v3324_v61 }
  0xce   : > { %2205 = vmatprep.subr.bf16.mxu0 %v3328_v63  ;;  %v3051_v63 = vld [vmem:[%s3891_s1 + $0xd8] sm:$0xff]  }
  0xd1   : > { %2206 = vmatpush1.bf16.msra.mxu0 %v3335_v3  ;;  %v481_v3 = vpop.permute.xlu0 %480 }
  0xd4   : > { %1734 = vmatmul.mubr.bf16.gmra.mrb[80].mxu0 %v3044_v20  ;;  %v511_v20 = vpop.permute.xlu1 %510 }
  0xd5   : > { %1743 = vmatprep.mubr.bf16.mxu0 %v3144_v2  ;;  %v496_v19 = vpop.permute.xlu0 %495 }
  0xd9   : > { %v506_v41 = vpop.permute.xlu0 %505 }
  0xdc   : > { %1744 = vmatmul.mubr.bf16.gmra.mrb[84].mxu0 %v3045_v22 }
  0xdd   : > { %1753 = vmatprep.mubr.bf16.mxu0 %v3144_v2 }
  0xe4   : > { %1754 = vmatmul.mubr.bf16.gmra.mrb[88].mxu0 %v3046_v28 }
  0xe5   : > { %1763 = vmatprep.mubr.bf16.mxu0 %v3144_v2 }
  0xec   : > { %1764 = vmatmul.mubr.bf16.gmra.mrb[92].mxu0 %v3047_v30 }
  0xed   : > { %2223 = vmatprep.mubr.bf16.mxu0 %v3144_v2 }
  0xf4   : > { %2224 = vmatmul.mubr.bf16.vlgmr.msra.gmra.mrb[96].mxu0 %v3048_v37 }
  0xf5   : > { %2233 = vmatprep.mubr.bf16.mxu0 %v3144_v2 }
  0xfc   : > { %2234 = vmatmul.mubr.bf16.gmra.mrb[100].mxu0 %v3049_v39 }
  0xfd   : > { %2243 = vmatprep.mubr.bf16.mxu0 %v3144_v2 }
 0x104   : > { %2244 = vmatmul.mubr.bf16.gmra.mrb[104].mxu0 %v3050_v45 }
 0x105   : > { %2253 = vmatprep.mubr.bf16.mxu0 %v3144_v2 }
 0x107   : > { %v635_v53 = vpop.f32.mrb[0].mxu0 }
 0x108   : > { %v636_v54 = vadd.f32 %v635_v53, %v476_v47  ;;  %v637_v61 = vpop.f32.mrb[1].mxu0 }
 0x109   : > { %v638_v46 = vadd.f32 %v637_v61, %v476_v47  ;;  %v639_v48 = vpop.f32.mrb[2].mxu0 }
 0x10a   : > { %v640_v49 = vadd.f32 %v639_v48, %v481_v3  ;;  %v641_v50 = vpop.f32.mrb[3].mxu0  ;;  %v714_v55 = vmax.f32 %v636_v54, 0.0 }
 0x10b   : > { %v642_v52 = vadd.f32 %v641_v50, %v481_v3  ;;  %v715_v57 = vmax.f32 %v638_v46, 0.0  ;;  %v3055_v50 = vld [vmem:[%s3891_s1 + $0xf8] sm:$0xff]  }
 0x10c   : > { %v716_v56 = vmax.f32 %v640_v49, 0.0  ;;  %2254 = vmatmul.mubr.bf16.gmra.mrb[108].mxu0 %v3051_v63  ;;  %v516_v63 = vpop.permute.xlu0 %515 }
 0x10d   : > { %v717_v58 = vmax.f32 %v642_v52, 0.0  ;;  %2263 = vmatprep.mubr.bf16.mxu0 %v3144_v2 }
 0x10e   : > { %v762_v59 = vpack.c.bf16 %v716_v56, %v714_v55 }
 0x10f   : > { %v645_v60 = vpop.f32.mrb[4].mxu0  ;;  %v763_v62 = vpack.c.bf16 %v717_v58, %v715_v57 }
 0x110   : > { %v646_v0 = vadd.f32 %v645_v60, %v486_v51  ;;  %v647_v1 = vpop.f32.mrb[5].mxu0 }
 0x111   : > { %v648_v6 = vadd.f32 %v647_v1, %v486_v51  ;;  %v649_v7 = vpop.f32.mrb[6].mxu0  ;;  %826 = vmatprep.subr.bf16.mxu1 %v763_v62  ;;  %v521_v51 = vpop.permute.xlu1 %520 }
 0x112   : > { %v650_v8 = vadd.f32 %v649_v7, %v491_v5  ;;  %v651_v9 = vpop.f32.mrb[7].mxu0  ;;  %827 = vmatpush1.bf16.msra.mxu1 %v762_v59  ;;  %v718_v12 = vmax.f32 %v646_v0, 0.0 }
 0x113   : > { %v652_v11 = vadd.f32 %v651_v9, %v491_v5  ;;  %v719_v16 = vmax.f32 %v648_v6, 0.0 }
 0x114   : > { %v720_v13 = vmax.f32 %v650_v8, 0.0  ;;  %2264 = vmatmul.mubr.bf16.gmra.mrb[112].mxu0 %v3052_v4  ;;  %v526_v4 = vpop.permute.xlu0 %525 }
 0x115   : > { %v721_v17 = vmax.f32 %v652_v11, 0.0  ;;  %2273 = vmatprep.mubr.bf16.mxu0 %v3144_v2  ;;  %v531_v9 = vpop.permute.xlu1 %530 }
 0x116   : > { %v764_v18 = vpack.c.bf16 %v720_v13, %v718_v12 }
 0x117   : > { %v765_v21 = vpack.c.bf16 %v721_v17, %v719_v16  ;;  %v655_v23 = vpop.f32.mrb[8].mxu0 }
 0x118   : > { %v656_v24 = vadd.f32 %v655_v23, %v496_v19  ;;  %v657_v25 = vpop.f32.mrb[9].mxu0 }
 0x119   : > { %v658_v29 = vadd.f32 %v657_v25, %v496_v19  ;;  %v659_v31 = vpop.f32.mrb[10].mxu0  ;;  %828 = vmatprep.subr.bf16.mxu1 %v765_v21  ;;  %v536_v25 = vpop.permute.xlu0 %535 }
 0x11a   : > { %v660_v10 = vadd.f32 %v659_v31, %v501_v27  ;;  %v661_v32 = vpop.f32.mrb[11].mxu0  ;;  %829 = vmatpush1.bf16.msra.mxu1 %v764_v18  ;;  %v722_v34 = vmax.f32 %v656_v24, 0.0 }
 0x11b   : > { %v662_v33 = vadd.f32 %v661_v32, %v501_v27  ;;  %v723_v36 = vmax.f32 %v658_v29, 0.0 }
 0x11c   : > { %v724_v35 = vmax.f32 %v660_v10, 0.0  ;;  %2274 = vmatmul.mubr.bf16.gmra.mrb[116].mxu0 %v3053_v26  ;;  %v541_v10 = vpop.permute.xlu1 %540 }
 0x11d   : > { %v725_v38 = vmax.f32 %v662_v33, 0.0  ;;  %2283 = vmatprep.mubr.bf16.mxu0 %v3144_v2 }
 0x11e   : > { %v766_v40 = vpack.c.bf16 %v724_v35, %v722_v34 }
 0x11f   : > { %v767_v42 = vpack.c.bf16 %v725_v38, %v723_v36  ;;  %v665_v43 = vpop.f32.mrb[12].mxu0 }
 0x120   : > { %v666_v44 = vadd.f32 %v665_v43, %v506_v41  ;;  %v667_v14 = vpop.f32.mrb[13].mxu0 }
 0x121   : > { %v668_v22 = vadd.f32 %v667_v14, %v506_v41  ;;  %v669_v28 = vpop.f32.mrb[14].mxu0  ;;  %830 = vmatprep.subr.bf16.mxu1 %v767_v42 }
 0x122   : > { %v670_v30 = vadd.f32 %v669_v28, %v511_v20  ;;  %v671_v37 = vpop.f32.mrb[15].mxu0  ;;  %831 = vmatpush1.bf16.msra.mxu1 %v766_v40  ;;  %v726_v45 = vmax.f32 %v666_v44, 0.0  ;;  %v546_v44 = vpop.permute.xlu0 %545 }
 0x123   : > { %v672_v39 = vadd.f32 %v671_v37, %v511_v20  ;;  %v727_v53 = vmax.f32 %v668_v22, 0.0  ;;  %v551_v28 = vpop.permute.xlu1 %550 }
 0x124   : > { %v728_v47 = vmax.f32 %v670_v30, 0.0  ;;  %2284 = vmatmul.mubr.bf16.gmra.mrb[120].mxu0 %v3054_v15 }
 0x125   : > { %v729_v54 = vmax.f32 %v672_v39, 0.0  ;;  %2293 = vmatprep.mubr.bf16.mxu0 %v3144_v2 }
 0x126   : > { %v768_v61 = vpack.c.bf16 %v728_v47, %v726_v45 }
 0x127   : > { %v769_v3 = vpack.c.bf16 %v729_v54, %v727_v53  ;;  %v675_v46 = vpop.f32.mrb[16].mxu0 }
 0x128   : > { %v676_v48 = vadd.f32 %v675_v46, %v516_v63  ;;  %v677_v49 = vpop.f32.mrb[17].mxu0  ;;  %v1006_v46 = vpop.permute.xlu0 %1005 }
 0x129   : > { %v678_v52 = vadd.f32 %v677_v49, %v516_v63  ;;  %v679_v55 = vpop.f32.mrb[18].mxu0  ;;  %832 = vmatprep.subr.bf16.mxu1 %v769_v3 }
 0x12a   : > { %v680_v56 = vadd.f32 %v679_v55, %v521_v51  ;;  %v681_v57 = vpop.f32.mrb[19].mxu0  ;;  %833 = vmatpush1.bf16.msra.mxu1 %v768_v61  ;;  %v730_v59 = vmax.f32 %v676_v48, 0.0 }
 0x12b   : > { %v682_v58 = vadd.f32 %v681_v57, %v521_v51  ;;  %v731_v62 = vmax.f32 %v678_v52, 0.0  ;;  %v1011_v52 = vpop.permute.xlu1 %1010  ;;  %v3056_v57 = vld [vmem:[%s3893_s3] ss:$16 sps:$4 sm:$0xff]  }
 0x12c   : > { %v732_v60 = vmax.f32 %v680_v56, 0.0  ;;  %2294 = vmatmul.mubr.bf16.gmra.mrb[124].mxu0 %v3055_v50 }
 0x12d   : > { %v733_v0 = vmax.f32 %v682_v58, 0.0 }
 0x12e   : > { %v770_v1 = vpack.c.bf16 %v732_v60, %v730_v59 }
 0x12f   : > { %v771_v5 = vpack.c.bf16 %v733_v0, %v731_v62  ;;  %v685_v6 = vpop.f32.mrb[20].mxu0 }
 0x130   : > { %v686_v7 = vadd.f32 %v685_v6, %v526_v4  ;;  %v687_v8 = vpop.f32.mrb[21].mxu0  ;;  %v1016_v6 = vpop.permute.xlu0 %1015 }
 0x131   : > { %v688_v11 = vadd.f32 %v687_v8, %v526_v4  ;;  %v689_v12 = vpop.f32.mrb[22].mxu0  ;;  %834 = vmatprep.subr.bf16.mxu1 %v771_v5 }
 0x132   : > { %v690_v13 = vadd.f32 %v689_v12, %v531_v9  ;;  %v691_v16 = vpop.f32.mrb[23].mxu0  ;;  %835 = vmatpush1.bf16.msra.mxu1 %v770_v1  ;;  %v734_v18 = vmax.f32 %v686_v7, 0.0  ;;  %v1021_v12 = vpop.permute.xlu1 %1020 }
 0x133   : > { %v692_v17 = vadd.f32 %v691_v16, %v531_v9  ;;  %v735_v21 = vmax.f32 %v688_v11, 0.0 }
 0x134   : > { %v736_v19 = vmax.f32 %v690_v13, 0.0 }
 0x135   : > { %v737_v23 = vmax.f32 %v692_v17, 0.0  ;;  %v3057_v17 = vld [vmem:[%s3893_s3 + $0x20] ss:$16 sps:$4 sm:$0xff]  }
 0x136   : > { %v772_v24 = vpack.c.bf16 %v736_v19, %v734_v18 }
 0x137   : > { %v773_v26 = vpack.c.bf16 %v737_v23, %v735_v21  ;;  %v695_v27 = vpop.f32.mrb[24].mxu0 }
 0x138   : > { %v696_v29 = vadd.f32 %v695_v27, %v536_v25  ;;  %v697_v31 = vpop.f32.mrb[25].mxu0 }
 0x139   : > { %v698_v32 = vadd.f32 %v697_v31, %v536_v25  ;;  %v699_v33 = vpop.f32.mrb[26].mxu0  ;;  %836 = vmatprep.subr.bf16.mxu1 %v773_v26 }
 0x13a   : > { %v700_v34 = vadd.f32 %v699_v33, %v541_v10  ;;  %v701_v35 = vpop.f32.mrb[27].mxu0  ;;  %837 = vmatpush1.bf16.msra.mxu1 %v772_v24  ;;  %v738_v38 = vmax.f32 %v696_v29, 0.0  ;;  %v1026_v29 = vpop.permute.xlu0 %1025 }
 0x13b   : > { %v702_v36 = vadd.f32 %v701_v35, %v541_v10  ;;  %v739_v41 = vmax.f32 %v698_v32, 0.0 }
 0x13c   : > { %v740_v40 = vmax.f32 %v700_v34, 0.0  ;;  %v1031_v34 = vpop.permute.xlu1 %1030 }
 0x13d   : > { %v741_v42 = vmax.f32 %v702_v36, 0.0 }
 0x13e   : > { %v774_v43 = vpack.c.bf16 %v740_v40, %v738_v38  ;;  %v3058_v38 = vld [vmem:[%s3893_s3 + $0x40] ss:$16 sps:$4 sm:$0xff]  }
 0x13f   : > { %v775_v14 = vpack.c.bf16 %v741_v42, %v739_v41  ;;  %v705_v15 = vpop.f32.mrb[28].mxu0 }
 0x140   : > { %v706_v20 = vadd.f32 %v705_v15, %v546_v44  ;;  %v707_v22 = vpop.f32.mrb[29].mxu0 }
 0x141   : > { %v708_v30 = vadd.f32 %v707_v22, %v546_v44  ;;  %v709_v37 = vpop.f32.mrb[30].mxu0  ;;  %838 = vmatprep.subr.bf16.mxu1 %v775_v14  ;;  %v1036_v22 = vpop.permute.xlu0 %1035 }
 0x142   : > { %v710_v39 = vadd.f32 %v709_v37, %v551_v28  ;;  %v711_v45 = vpop.f32.mrb[31].mxu0  ;;  %839 = vmatpush1.bf16.msra.mxu1 %v774_v43  ;;  %v742_v53 = vmax.f32 %v706_v20, 0.0 }
 0x143   : > { %v712_v47 = vadd.f32 %v711_v45, %v551_v28  ;;  %v743_v61 = vmax.f32 %v708_v30, 0.0  ;;  %v1041_v45 = vpop.permute.xlu1 %1040 }
 0x144   : > { %v744_v54 = vmax.f32 %v710_v39, 0.0 }
 0x145   : > { %v745_v63 = vmax.f32 %v712_v47, 0.0 }
 0x146   : > { %v776_v3 = vpack.c.bf16 %v744_v54, %v742_v53  ;;  %v3059_v54 = vld [vmem:[%s3893_s3 + $0x60] ss:$16 sps:$4 sm:$0xff]  }
 0x147   : > { %v777_v48 = vpack.c.bf16 %v745_v63, %v743_v61  ;;  %v1165_v49 = vpop.f32.mrb[32].mxu0 }
 0x148   : > { %v1166_v50 = vadd.f32 %v1165_v49, %v1006_v46  ;;  %v1167_v51 = vpop.f32.mrb[33].mxu0 }
 0x149   : > { %v1168_v55 = vadd.f32 %v1167_v51, %v1006_v46  ;;  %840 = vmatprep.subr.bf16.mxu1 %v777_v48  ;;  %v1169_v56 = vpop.f32.mrb[34].mxu0 }
 0x14a   : > { %v1170_v58 = vadd.f32 %v1169_v56, %v1011_v52  ;;  %841 = vmatpush1.bf16.msra.mxu1 %v776_v3  ;;  %v1171_v59 = vpop.f32.mrb[35].mxu0  ;;  %v1244_v62 = vmax.f32 %v1166_v50, 0.0 }
 0x14b   : > { %v1172_v60 = vadd.f32 %v1171_v59, %v1011_v52  ;;  %v1245_v1 = vmax.f32 %v1168_v55, 0.0  ;;  %v1046_v52 = vpop.permute.xlu0 %1045  ;;  %v1051_v59 = vpop.permute.xlu1 %1050 }
 0x14c   : > { %v1246_v0 = vmax.f32 %v1170_v58, 0.0 }
 0x14d   : > { %v1247_v4 = vmax.f32 %v1172_v60, 0.0  ;;  %859 = vmatmul.mubr.bf16.vlgmr.msra.gmra.mrb[0].mxu1 %v3056_v57 }
 0x14e   : > { %v1292_v5 = vpack.c.bf16 %v1246_v0, %v1244_v62  ;;  %868 = vmatprep.mubr.bf16.mxu1 %v3144_v2  ;;  %v3060_v0 = vld [vmem:[%s3893_s3 + $0x80] ss:$16 sps:$4 sm:$0xff]  }
 0x14f   : > { %v1293_v7 = vpack.c.bf16 %v1247_v4, %v1245_v1  ;;  %v1175_v8 = vpop.f32.mrb[36].mxu0 }
 0x150   : > { %v1176_v9 = vadd.f32 %v1175_v8, %v1016_v6  ;;  %v1177_v11 = vpop.f32.mrb[37].mxu0 }
 0x151   : > { %v1178_v13 = vadd.f32 %v1177_v11, %v1016_v6  ;;  %v1179_v16 = vpop.f32.mrb[38].mxu0  ;;  %1356 = vmatprep.subr.bf16.mxu1 %v1293_v7 }
 0x152   : > { %v1180_v18 = vadd.f32 %v1179_v16, %v1021_v12  ;;  %v1181_v19 = vpop.f32.mrb[39].mxu0  ;;  %1357 = vmatpush1.bf16.msra.mxu1 %v1292_v5  ;;  %v1248_v23 = vmax.f32 %v1176_v9, 0.0 }
 0x153   : > { %v1182_v21 = vadd.f32 %v1181_v19, %v1021_v12  ;;  %v1249_v25 = vmax.f32 %v1178_v13, 0.0  ;;  %v1056_v12 = vpop.permute.xlu0 %1055  ;;  %v1061_v19 = vpop.permute.xlu1 %1060 }
 0x154   : > { %v1250_v24 = vmax.f32 %v1180_v18, 0.0 }
 0x155   : > { %v1251_v26 = vmax.f32 %v1182_v21, 0.0  ;;  %869 = vmatmul.mubr.bf16.gmra.mrb[4].mxu1 %v3057_v17 }
 0x156   : > { %v1294_v27 = vpack.c.bf16 %v1250_v24, %v1248_v23  ;;  %878 = vmatprep.mubr.bf16.mxu1 %v3144_v2  ;;  %v3061_v24 = vld [vmem:[%s3893_s3 + $0xa0] ss:$16 sps:$4 sm:$0xff]  }
 0x157   : > { %v1295_v31 = vpack.c.bf16 %v1251_v26, %v1249_v25  ;;  %v1185_v10 = vpop.f32.mrb[40].mxu0 }
 0x158   : > { %v1186_v32 = vadd.f32 %v1185_v10, %v1026_v29  ;;  %v1187_v33 = vpop.f32.mrb[41].mxu0 }
 0x159   : > { %v1188_v35 = vadd.f32 %v1187_v33, %v1026_v29  ;;  %v1189_v36 = vpop.f32.mrb[42].mxu0  ;;  %1358 = vmatprep.subr.bf16.mxu1 %v1295_v31 }
 0x15a   : > { %v1190_v40 = vadd.f32 %v1189_v36, %v1031_v34  ;;  %v1191_v41 = vpop.f32.mrb[43].mxu0  ;;  %1359 = vmatpush1.bf16.msra.mxu1 %v1294_v27  ;;  %v1252_v43 = vmax.f32 %v1186_v32, 0.0 }
 0x15b   : > { %v1192_v42 = vadd.f32 %v1191_v41, %v1031_v34  ;;  %v1253_v14 = vmax.f32 %v1188_v35, 0.0  ;;  %v1066_v34 = vpop.permute.xlu0 %1065  ;;  %v1071_v41 = vpop.permute.xlu1 %1070 }
 0x15c   : > { %v1254_v44 = vmax.f32 %v1190_v40, 0.0 }
 0x15d   : > { %v1255_v15 = vmax.f32 %v1192_v42, 0.0  ;;  %879 = vmatmul.mubr.bf16.gmra.mrb[8].mxu1 %v3058_v38 }
 0x15e   : > { %v1296_v20 = vpack.c.bf16 %v1254_v44, %v1252_v43  ;;  %888 = vmatprep.mubr.bf16.mxu1 %v3144_v2  ;;  %v3062_v44 = vld [vmem:[%s3893_s3 + $0xc0] ss:$16 sps:$4 sm:$0xff]  }
 0x15f   : > { %v1297_v28 = vpack.c.bf16 %v1255_v15, %v1253_v14  ;;  %v1195_v30 = vpop.f32.mrb[44].mxu0 }
 0x160   : > { %v1196_v37 = vadd.f32 %v1195_v30, %v1036_v22  ;;  %v1197_v39 = vpop.f32.mrb[45].mxu0 }
 0x161   : > { %v1198_v47 = vadd.f32 %v1197_v39, %v1036_v22  ;;  %v1199_v53 = vpop.f32.mrb[46].mxu0  ;;  %1360 = vmatprep.subr.bf16.mxu1 %v1297_v28 }
 0x162   : > { %v1200_v61 = vadd.f32 %v1199_v53, %v1041_v45  ;;  %v1201_v63 = vpop.f32.mrb[47].mxu0  ;;  %1361 = vmatpush1.bf16.msra.mxu1 %v1296_v20  ;;  %v1256_v46 = vmax.f32 %v1196_v37, 0.0 }
 0x163   : > { %v1202_v3 = vadd.f32 %v1201_v63, %v1041_v45  ;;  %v1257_v49 = vmax.f32 %v1198_v47, 0.0  ;;  %v1076_v45 = vpop.permute.xlu0 %1075  ;;  %v1081_v63 = vpop.permute.xlu1 %1080 }
 0x164   : > { %v1258_v48 = vmax.f32 %v1200_v61, 0.0 }
 0x165   : > { %v1259_v50 = vmax.f32 %v1202_v3, 0.0  ;;  %889 = vmatmul.mubr.bf16.gmra.mrb[12].mxu1 %v3059_v54 }
 0x166   : > { %v1298_v51 = vpack.c.bf16 %v1258_v48, %v1256_v46  ;;  %898 = vmatprep.mubr.bf16.mxu1 %v3144_v2  ;;  %v3063_v48 = vld [vmem:[%s3893_s3 + $0xe0] ss:$16 sps:$4 sm:$0xff]  }
 0x167   : > { %v1299_v55 = vpack.c.bf16 %v1259_v50, %v1257_v49  ;;  %v1205_v56 = vpop.f32.mrb[48].mxu0 }
 0x168   : > { %v1206_v57 = vadd.f32 %v1205_v56, %v1046_v52  ;;  %v1207_v58 = vpop.f32.mrb[49].mxu0 }
 0x169   : > { %v1208_v60 = vadd.f32 %v1207_v58, %v1046_v52  ;;  %v1209_v62 = vpop.f32.mrb[50].mxu0  ;;  %1362 = vmatprep.subr.bf16.mxu1 %v1299_v55 }
 0x16a   : > { %v1210_v1 = vadd.f32 %v1209_v62, %v1051_v59  ;;  %v1211_v4 = vpop.f32.mrb[51].mxu0  ;;  %1363 = vmatpush1.bf16.msra.mxu1 %v1298_v51  ;;  %v1260_v6 = vmax.f32 %v1206_v57, 0.0 }
 0x16b   : > { %v1212_v5 = vadd.f32 %v1211_v4, %v1051_v59  ;;  %v1261_v8 = vmax.f32 %v1208_v60, 0.0  ;;  %v1536_v59 = vpop.permute.xlu0 %1535  ;;  %v1541_v4 = vpop.permute.xlu1 %1540 }
 0x16c   : > { %v1262_v7 = vmax.f32 %v1210_v1, 0.0 }
 0x16d   : > { %v1263_v9 = vmax.f32 %v1212_v5, 0.0  ;;  %899 = vmatmul.mubr.bf16.gmra.mrb[16].mxu1 %v3060_v0 }
 0x16e   : > { %v1300_v11 = vpack.c.bf16 %v1262_v7, %v1260_v6  ;;  %908 = vmatprep.mubr.bf16.mxu1 %v3144_v2  ;;  %v3064_v7 = vld [vmem:[%s3893_s3 + $0x4] ss:$16 sps:$4 sm:$0xff]  }
 0x16f   : > { %v1301_v13 = vpack.c.bf16 %v1263_v9, %v1261_v8  ;;  %v1215_v16 = vpop.f32.mrb[52].mxu0 }
 0x170   : > { %v1216_v17 = vadd.f32 %v1215_v16, %v1056_v12  ;;  %v1217_v18 = vpop.f32.mrb[53].mxu0 }
 0x171   : > { %v1218_v21 = vadd.f32 %v1217_v18, %v1056_v12  ;;  %v1219_v23 = vpop.f32.mrb[54].mxu0  ;;  %1364 = vmatprep.subr.bf16.mxu1 %v1301_v13 }
 0x172   : > { %v1220_v25 = vadd.f32 %v1219_v23, %v1061_v19  ;;  %v1221_v26 = vpop.f32.mrb[55].mxu0  ;;  %1365 = vmatpush1.bf16.msra.mxu1 %v1300_v11  ;;  %v1264_v29 = vmax.f32 %v1216_v17, 0.0 }
 0x173   : > { %v1222_v27 = vadd.f32 %v1221_v26, %v1061_v19  ;;  %v1265_v10 = vmax.f32 %v1218_v21, 0.0  ;;  %v1546_v19 = vpop.permute.xlu0 %1545  ;;  %v1551_v26 = vpop.permute.xlu1 %1550 }
 0x174   : > { %v1266_v31 = vmax.f32 %v1220_v25, 0.0 }
 0x175   : > { %v1267_v32 = vmax.f32 %v1222_v27, 0.0  ;;  %909 = vmatmul.mubr.bf16.gmra.mrb[20].mxu1 %v3061_v24 }
 0x176   : > { %v1302_v33 = vpack.c.bf16 %v1266_v31, %v1264_v29  ;;  %918 = vmatprep.mubr.bf16.mxu1 %v3144_v2  ;;  %v3065_v31 = vld [vmem:[%s3893_s3 + $0x24] ss:$16 sps:$4 sm:$0xff]  }
 0x177   : > { %v1303_v35 = vpack.c.bf16 %v1267_v32, %v1265_v10  ;;  %v1225_v36 = vpop.f32.mrb[56].mxu0 }
 0x178   : > { %v1226_v38 = vadd.f32 %v1225_v36, %v1066_v34  ;;  %v1227_v40 = vpop.f32.mrb[57].mxu0 }
 0x179   : > { %v1228_v42 = vadd.f32 %v1227_v40, %v1066_v34  ;;  %v1229_v43 = vpop.f32.mrb[58].mxu0  ;;  %1366 = vmatprep.subr.bf16.mxu1 %v1303_v35 }
 0x17a   : > { %v1230_v14 = vadd.f32 %v1229_v43, %v1071_v41  ;;  %v1231_v15 = vpop.f32.mrb[59].mxu0  ;;  %1367 = vmatpush1.bf16.msra.mxu1 %v1302_v33  ;;  %v1268_v22 = vmax.f32 %v1226_v38, 0.0 }
 0x17b   : > { %v1232_v20 = vadd.f32 %v1231_v15, %v1071_v41  ;;  %v1269_v30 = vmax.f32 %v1228_v42, 0.0  ;;  %v1556_v41 = vpop.permute.xlu0 %1555  ;;  %v1561_v15 = vpop.permute.xlu1 %1560 }
 0x17c   : > { %v1270_v28 = vmax.f32 %v1230_v14, 0.0 }
 0x17d   : > { %v1271_v37 = vmax.f32 %v1232_v20, 0.0  ;;  %919 = vmatmul.mubr.bf16.gmra.mrb[24].mxu1 %v3062_v44 }
 0x17e   : > { %v1304_v39 = vpack.c.bf16 %v1270_v28, %v1268_v22  ;;  %928 = vmatprep.mubr.bf16.mxu1 %v3144_v2  ;;  %v3066_v28 = vld [vmem:[%s3893_s3 + $0x44] ss:$16 sps:$4 sm:$0xff]  }
 0x17f   : > { %v1305_v47 = vpack.c.bf16 %v1271_v37, %v1269_v30  ;;  %v1235_v53 = vpop.f32.mrb[60].mxu0 }
 0x180   : > { %v1236_v54 = vadd.f32 %v1235_v53, %v1076_v45  ;;  %v1237_v61 = vpop.f32.mrb[61].mxu0 }
 0x181   : > { %v1238_v3 = vadd.f32 %v1237_v61, %v1076_v45  ;;  %v1239_v46 = vpop.f32.mrb[62].mxu0  ;;  %1368 = vmatprep.subr.bf16.mxu1 %v1305_v47 }
 0x182   : > { %v1240_v49 = vadd.f32 %v1239_v46, %v1081_v63  ;;  %v1241_v50 = vpop.f32.mrb[63].mxu0  ;;  %1369 = vmatpush1.bf16.msra.mxu1 %v1304_v39  ;;  %v1272_v52 = vmax.f32 %v1236_v54, 0.0 }
 0x183   : > { %v1242_v51 = vadd.f32 %v1241_v50, %v1081_v63  ;;  %v1273_v56 = vmax.f32 %v1238_v3, 0.0  ;;  %v1566_v63 = vpop.permute.xlu0 %1565  ;;  %v1571_v50 = vpop.permute.xlu1 %1570 }
 0x184   : > { %v1274_v55 = vmax.f32 %v1240_v49, 0.0 }
 0x185   : > { %v1275_v57 = vmax.f32 %v1242_v51, 0.0  ;;  %929 = vmatmul.mubr.bf16.gmra.mrb[28].mxu1 %v3063_v48 }
 0x186   : > { %v1306_v58 = vpack.c.bf16 %v1274_v55, %v1272_v52  ;;  %1388 = vmatprep.mubr.bf16.mxu1 %v3144_v2  ;;  %v3067_v55 = vld [vmem:[%s3893_s3 + $0x64] ss:$16 sps:$4 sm:$0xff]  }
 0x187   : > { %v1307_v60 = vpack.c.bf16 %v1275_v57, %v1273_v56  ;;  %v1695_v62 = vpop.f32.mrb[64].mxu0 }
 0x188   : > { %v1696_v0 = vadd.f32 %v1695_v62, %v1536_v59  ;;  %v1697_v1 = vpop.f32.mrb[65].mxu0 }
 0x189   : > { %v1698_v5 = vadd.f32 %v1697_v1, %v1536_v59  ;;  %1370 = vmatprep.subr.bf16.mxu1 %v1307_v60  ;;  %v1699_v6 = vpop.f32.mrb[66].mxu0 }
 0x18a   : > { %v1700_v8 = vadd.f32 %v1699_v6, %v1541_v4  ;;  %1371 = vmatpush1.bf16.msra.mxu1 %v1306_v58  ;;  %v1701_v9 = vpop.f32.mrb[67].mxu0  ;;  %v1774_v12 = vmax.f32 %v1696_v0, 0.0 }
 0x18b   : > { %v1702_v11 = vadd.f32 %v1701_v9, %v1541_v4  ;;  %v1775_v16 = vmax.f32 %v1698_v5, 0.0  ;;  %v1576_v4 = vpop.permute.xlu0 %1575  ;;  %v1581_v9 = vpop.permute.xlu1 %1580 }
 0x18c   : > { %v1776_v13 = vmax.f32 %v1700_v8, 0.0 }
 0x18d   : > { %v1777_v17 = vmax.f32 %v1702_v11, 0.0  ;;  %1389 = vmatmul.mubr.bf16.vlgmr.msra.gmra.mrb[0].mxu1 %v3064_v7 }
 0x18e   : > { %v1822_v18 = vpack.c.bf16 %v1776_v13, %v1774_v12  ;;  %1398 = vmatprep.mubr.bf16.mxu1 %v3144_v2  ;;  %v3068_v13 = vld [vmem:[%s3893_s3 + $0x84] ss:$16 sps:$4 sm:$0xff]  }
 0x18f   : > { %v1823_v21 = vpack.c.bf16 %v1777_v17, %v1775_v16  ;;  %v1705_v23 = vpop.f32.mrb[68].mxu0 }
 0x190   : > { %v1706_v24 = vadd.f32 %v1705_v23, %v1546_v19  ;;  %v1707_v25 = vpop.f32.mrb[69].mxu0 }
 0x191   : > { %v1708_v27 = vadd.f32 %v1707_v25, %v1546_v19  ;;  %v1709_v29 = vpop.f32.mrb[70].mxu0  ;;  %1886 = vmatprep.subr.bf16.mxu1 %v1823_v21 }
 0x192   : > { %v1710_v10 = vadd.f32 %v1709_v29, %v1551_v26  ;;  %v1711_v32 = vpop.f32.mrb[71].mxu0  ;;  %1887 = vmatpush1.bf16.msra.mxu1 %v1822_v18  ;;  %v1778_v34 = vmax.f32 %v1706_v24, 0.0 }
 0x193   : > { %v1712_v33 = vadd.f32 %v1711_v32, %v1551_v26  ;;  %v1779_v36 = vmax.f32 %v1708_v27, 0.0  ;;  %v1586_v26 = vpop.permute.xlu0 %1585  ;;  %v1591_v32 = vpop.permute.xlu1 %1590 }
 0x194   : > { %v1780_v35 = vmax.f32 %v1710_v10, 0.0 }
 0x195   : > { %v1781_v38 = vmax.f32 %v1712_v33, 0.0  ;;  %1399 = vmatmul.mubr.bf16.gmra.mrb[4].mxu1 %v3065_v31 }
 0x196   : > { %v1824_v40 = vpack.c.bf16 %v1780_v35, %v1778_v34  ;;  %1408 = vmatprep.mubr.bf16.mxu1 %v3144_v2  ;;  %v3069_v35 = vld [vmem:[%s3893_s3 + $0xa4] ss:$16 sps:$4 sm:$0xff]  }
 0x197   : > { %v1825_v42 = vpack.c.bf16 %v1781_v38, %v1779_v36  ;;  %v1715_v43 = vpop.f32.mrb[72].mxu0 }
 0x198   : > { %v1716_v44 = vadd.f32 %v1715_v43, %v1556_v41  ;;  %v1717_v14 = vpop.f32.mrb[73].mxu0 }
 0x199   : > { %v1718_v20 = vadd.f32 %v1717_v14, %v1556_v41  ;;  %v1719_v22 = vpop.f32.mrb[74].mxu0  ;;  %1888 = vmatprep.subr.bf16.mxu1 %v1825_v42 }
 0x19a   : > { %v1720_v30 = vadd.f32 %v1719_v22, %v1561_v15  ;;  %v1721_v37 = vpop.f32.mrb[75].mxu0  ;;  %1889 = vmatpush1.bf16.msra.mxu1 %v1824_v40  ;;  %v1782_v45 = vmax.f32 %v1716_v44, 0.0 }
 0x19b   : > { %v1722_v39 = vadd.f32 %v1721_v37, %v1561_v15  ;;  %v1783_v53 = vmax.f32 %v1718_v20, 0.0  ;;  %v1596_v15 = vpop.permute.xlu0 %1595  ;;  %v1601_v37 = vpop.permute.xlu1 %1600 }
 0x19c   : > { %v1784_v47 = vmax.f32 %v1720_v30, 0.0 }
 0x19d   : > { %v1785_v54 = vmax.f32 %v1722_v39, 0.0  ;;  %1409 = vmatmul.mubr.bf16.gmra.mrb[8].mxu1 %v3066_v28 }
 0x19e   : > { %v1826_v61 = vpack.c.bf16 %v1784_v47, %v1782_v45  ;;  %1418 = vmatprep.mubr.bf16.mxu1 %v3144_v2  ;;  %v3070_v47 = vld [vmem:[%s3893_s3 + $0xc4] ss:$16 sps:$4 sm:$0xff]  }
 0x19f   : > { %v1827_v3 = vpack.c.bf16 %v1785_v54, %v1783_v53  ;;  %v1725_v46 = vpop.f32.mrb[76].mxu0 }
 0x1a0   : > { %v1726_v48 = vadd.f32 %v1725_v46, %v1566_v63  ;;  %v1727_v49 = vpop.f32.mrb[77].mxu0 }
 0x1a1   : > { %v1728_v51 = vadd.f32 %v1727_v49, %v1566_v63  ;;  %v1729_v52 = vpop.f32.mrb[78].mxu0  ;;  %1890 = vmatprep.subr.bf16.mxu1 %v1827_v3 }
 0x1a2   : > { %v1730_v56 = vadd.f32 %v1729_v52, %v1571_v50  ;;  %v1731_v57 = vpop.f32.mrb[79].mxu0  ;;  %1891 = vmatpush1.bf16.msra.mxu1 %v1826_v61  ;;  %v1786_v59 = vmax.f32 %v1726_v48, 0.0 }
 0x1a3   : > { %v1732_v58 = vadd.f32 %v1731_v57, %v1571_v50  ;;  %v1787_v62 = vmax.f32 %v1728_v51, 0.0  ;;  %v1606_v50 = vpop.permute.xlu0 %1605  ;;  %v1611_v57 = vpop.permute.xlu1 %1610 }
 0x1a4   : > { %v1788_v60 = vmax.f32 %v1730_v56, 0.0 }
 0x1a5   : > { %v1789_v0 = vmax.f32 %v1732_v58, 0.0  ;;  %1419 = vmatmul.mubr.bf16.gmra.mrb[12].mxu1 %v3067_v55 }
 0x1a6   : > { %v1828_v1 = vpack.c.bf16 %v1788_v60, %v1786_v59  ;;  %1428 = vmatprep.mubr.bf16.mxu1 %v3144_v2  ;;  %v3071_v60 = vld [vmem:[%s3893_s3 + $0xe4] ss:$16 sps:$4 sm:$0xff]  }
 0x1a7   : > { %v1829_v5 = vpack.c.bf16 %v1789_v0, %v1787_v62  ;;  %v1735_v6 = vpop.f32.mrb[80].mxu0 }
 0x1a8   : > { %v1736_v7 = vadd.f32 %v1735_v6, %v1576_v4  ;;  %v1737_v8 = vpop.f32.mrb[81].mxu0 }
 0x1a9   : > { %v1738_v11 = vadd.f32 %v1737_v8, %v1576_v4  ;;  %v1739_v12 = vpop.f32.mrb[82].mxu0  ;;  %1892 = vmatprep.subr.bf16.mxu1 %v1829_v5 }
 0x1aa   : > { %v1740_v16 = vadd.f32 %v1739_v12, %v1581_v9  ;;  %v1741_v17 = vpop.f32.mrb[83].mxu0  ;;  %1893 = vmatpush1.bf16.msra.mxu1 %v1828_v1  ;;  %v1790_v19 = vmax.f32 %v1736_v7, 0.0 }
 0x1ab   : > { %v1742_v18 = vadd.f32 %v1741_v17, %v1581_v9  ;;  %v1791_v23 = vmax.f32 %v1738_v11, 0.0  ;;  %v2066_v9 = vpop.permute.xlu0 %2065  ;;  %v2071_v17 = vpop.permute.xlu1 %2070 }
 0x1ac   : > { %v1792_v21 = vmax.f32 %v1740_v16, 0.0 }
 0x1ad   : > { %v1793_v24 = vmax.f32 %v1742_v18, 0.0  ;;  %1429 = vmatmul.mubr.bf16.gmra.mrb[16].mxu1 %v3068_v13 }
 0x1ae   : > { %v1830_v25 = vpack.c.bf16 %v1792_v21, %v1790_v19  ;;  %1438 = vmatprep.mubr.bf16.mxu1 %v3144_v2  ;;  %v3072_v21 = vld [vmem:[%s3893_s3 + $0x8] ss:$16 sps:$4 sm:$0xff]  }
 0x1af   : > { %v1831_v27 = vpack.c.bf16 %v1793_v24, %v1791_v23  ;;  %v1745_v29 = vpop.f32.mrb[84].mxu0 }
 0x1b0   : > { %v1746_v31 = vadd.f32 %v1745_v29, %v1586_v26  ;;  %v1747_v10 = vpop.f32.mrb[85].mxu0 }
 0x1b1   : > { %v1748_v33 = vadd.f32 %v1747_v10, %v1586_v26  ;;  %v1749_v34 = vpop.f32.mrb[86].mxu0  ;;  %1894 = vmatprep.subr.bf16.mxu1 %v1831_v27 }
 0x1b2   : > { %v1750_v36 = vadd.f32 %v1749_v34, %v1591_v32  ;;  %v1751_v38 = vpop.f32.mrb[87].mxu0  ;;  %1895 = vmatpush1.bf16.msra.mxu1 %v1830_v25  ;;  %v1794_v41 = vmax.f32 %v1746_v31, 0.0 }
 0x1b3   : > { %v1752_v40 = vadd.f32 %v1751_v38, %v1591_v32  ;;  %v1795_v43 = vmax.f32 %v1748_v33, 0.0  ;;  %v2076_v32 = vpop.permute.xlu0 %2075  ;;  %v2081_v38 = vpop.permute.xlu1 %2080 }
 0x1b4   : > { %v1796_v42 = vmax.f32 %v1750_v36, 0.0 }
 0x1b5   : > { %v1797_v44 = vmax.f32 %v1752_v40, 0.0  ;;  %1439 = vmatmul.mubr.bf16.gmra.mrb[20].mxu1 %v3069_v35 }
 0x1b6   : > { %v1832_v14 = vpack.c.bf16 %v1796_v42, %v1794_v41  ;;  %1448 = vmatprep.mubr.bf16.mxu1 %v3144_v2  ;;  %v3073_v42 = vld [vmem:[%s3893_s3 + $0x28] ss:$16 sps:$4 sm:$0xff]  }
 0x1b7   : > { %v1833_v20 = vpack.c.bf16 %v1797_v44, %v1795_v43  ;;  %v1755_v22 = vpop.f32.mrb[88].mxu0 }
 0x1b8   : > { %v1756_v28 = vadd.f32 %v1755_v22, %v1596_v15  ;;  %v1757_v30 = vpop.f32.mrb[89].mxu0 }
 0x1b9   : > { %v1758_v39 = vadd.f32 %v1757_v30, %v1596_v15  ;;  %v1759_v45 = vpop.f32.mrb[90].mxu0  ;;  %1896 = vmatprep.subr.bf16.mxu1 %v1833_v20 }
 0x1ba   : > { %v1760_v53 = vadd.f32 %v1759_v45, %v1601_v37  ;;  %v1761_v54 = vpop.f32.mrb[91].mxu0  ;;  %1897 = vmatpush1.bf16.msra.mxu1 %v1832_v14  ;;  %v1798_v63 = vmax.f32 %v1756_v28, 0.0 }
 0x1bb   : > { %v1762_v61 = vadd.f32 %v1761_v54, %v1601_v37  ;;  %v1799_v46 = vmax.f32 %v1758_v39, 0.0  ;;  %v2086_v37 = vpop.permute.xlu0 %2085  ;;  %v2091_v54 = vpop.permute.xlu1 %2090 }
 0x1bc   : > { %v1800_v3 = vmax.f32 %v1760_v53, 0.0 }
 0x1bd   : > { %v1801_v48 = vmax.f32 %v1762_v61, 0.0  ;;  %1449 = vmatmul.mubr.bf16.gmra.mrb[24].mxu1 %v3070_v47 }
 0x1be   : > { %v1834_v49 = vpack.c.bf16 %v1800_v3, %v1798_v63  ;;  %1458 = vmatprep.mubr.bf16.mxu1 %v3144_v2  ;;  %v3074_v3 = vld [vmem:[%s3893_s3 + $0x48] ss:$16 sps:$4 sm:$0xff]  }
 0x1bf   : > { %v1835_v51 = vpack.c.bf16 %v1801_v48, %v1799_v46  ;;  %v1765_v52 = vpop.f32.mrb[92].mxu0 }
 0x1c0   : > { %v1766_v55 = vadd.f32 %v1765_v52, %v1606_v50  ;;  %v1767_v56 = vpop.f32.mrb[93].mxu0 }
 0x1c1   : > { %v1768_v58 = vadd.f32 %v1767_v56, %v1606_v50  ;;  %v1769_v59 = vpop.f32.mrb[94].mxu0  ;;  %1898 = vmatprep.subr.bf16.mxu1 %v1835_v51 }
 0x1c2   : > { %v1770_v62 = vadd.f32 %v1769_v59, %v1611_v57  ;;  %v1771_v0 = vpop.f32.mrb[95].mxu0  ;;  %1899 = vmatpush1.bf16.msra.mxu1 %v1834_v49  ;;  %v1802_v4 = vmax.f32 %v1766_v55, 0.0 }
 0x1c3   : > { %v1772_v1 = vadd.f32 %v1771_v0, %v1611_v57  ;;  %v1803_v6 = vmax.f32 %v1768_v58, 0.0  ;;  %v2096_v57 = vpop.permute.xlu0 %2095  ;;  %v2101_v0 = vpop.permute.xlu1 %2100 }
 0x1c4   : > { %v1804_v5 = vmax.f32 %v1770_v62, 0.0 }
 0x1c5   : > { %v1805_v7 = vmax.f32 %v1772_v1, 0.0  ;;  %1459 = vmatmul.mubr.bf16.gmra.mrb[28].mxu1 %v3071_v60 }
 0x1c6   : > { %v1836_v8 = vpack.c.bf16 %v1804_v5, %v1802_v4  ;;  %1918 = vmatprep.mubr.bf16.mxu1 %v3144_v2  ;;  %v3075_v5 = vld [vmem:[%s3893_s3 + $0x68] ss:$16 sps:$4 sm:$0xff]  }
 0x1c7   : > { %v1837_v11 = vpack.c.bf16 %v1805_v7, %v1803_v6  ;;  %v2225_v12 = vpop.f32.mrb[96].mxu0 }
 0x1c8   : > { %v2226_v13 = vadd.f32 %v2225_v12, %v2066_v9  ;;  %v2227_v16 = vpop.f32.mrb[97].mxu0 }
 0x1c9   : > { %v2228_v18 = vadd.f32 %v2227_v16, %v2066_v9  ;;  %1900 = vmatprep.subr.bf16.mxu1 %v1837_v11  ;;  %v2229_v19 = vpop.f32.mrb[98].mxu0 }
 0x1ca   : > { %v2230_v23 = vadd.f32 %v2229_v19, %v2071_v17  ;;  %1901 = vmatpush1.bf16.msra.mxu1 %v1836_v8  ;;  %v2231_v24 = vpop.f32.mrb[99].mxu0  ;;  %v2304_v26 = vmax.f32 %v2226_v13, 0.0 }
 0x1cb   : > { %v2232_v25 = vadd.f32 %v2231_v24, %v2071_v17  ;;  %v2305_v29 = vmax.f32 %v2228_v18, 0.0  ;;  %v2106_v17 = vpop.permute.xlu0 %2105  ;;  %v2111_v24 = vpop.permute.xlu1 %2110 }
 0x1cc   : > { %v2306_v27 = vmax.f32 %v2230_v23, 0.0 }
 0x1cd   : > { %v2307_v31 = vmax.f32 %v2232_v25, 0.0  ;;  %1919 = vmatmul.mubr.bf16.vlgmr.msra.gmra.mrb[0].mxu1 %v3072_v21 }
 0x1ce   : > { %v2352_v10 = vpack.c.bf16 %v2306_v27, %v2304_v26  ;;  %1928 = vmatprep.mubr.bf16.mxu1 %v3144_v2  ;;  %v3076_v27 = vld [vmem:[%s3893_s3 + $0x88] ss:$16 sps:$4 sm:$0xff]  }
 0x1cf   : > { %v2353_v33 = vpack.c.bf16 %v2307_v31, %v2305_v29  ;;  %v2235_v34 = vpop.f32.mrb[100].mxu0 }
 0x1d0   : > { %v2236_v35 = vadd.f32 %v2235_v34, %v2076_v32  ;;  %v2237_v36 = vpop.f32.mrb[101].mxu0 }
 0x1d1   : > { %v2238_v40 = vadd.f32 %v2237_v36, %v2076_v32  ;;  %v2239_v41 = vpop.f32.mrb[102].mxu0  ;;  %2416 = vmatprep.subr.bf16.mxu1 %v2353_v33 }
 0x1d2   : > { %v2240_v43 = vadd.f32 %v2239_v41, %v2081_v38  ;;  %v2241_v44 = vpop.f32.mrb[103].mxu0  ;;  %2417 = vmatpush1.bf16.msra.mxu1 %v2352_v10  ;;  %v2308_v15 = vmax.f32 %v2236_v35, 0.0 }
 0x1d3   : > { %v2242_v14 = vadd.f32 %v2241_v44, %v2081_v38  ;;  %v2309_v22 = vmax.f32 %v2238_v40, 0.0  ;;  %v2116_v38 = vpop.permute.xlu0 %2115  ;;  %v2121_v44 = vpop.permute.xlu1 %2120 }
 0x1d4   : > { %v2310_v20 = vmax.f32 %v2240_v43, 0.0 }
 0x1d5   : > { %v2311_v28 = vmax.f32 %v2242_v14, 0.0  ;;  %1929 = vmatmul.mubr.bf16.gmra.mrb[4].mxu1 %v3073_v42 }
 0x1d6   : > { %v2354_v30 = vpack.c.bf16 %v2310_v20, %v2308_v15  ;;  %1938 = vmatprep.mubr.bf16.mxu1 %v3144_v2  ;;  %v3077_v20 = vld [vmem:[%s3893_s3 + $0xa8] ss:$16 sps:$4 sm:$0xff]  }
 0x1d7   : > { %v2355_v39 = vpack.c.bf16 %v2311_v28, %v2309_v22  ;;  %v2245_v45 = vpop.f32.mrb[104].mxu0 }
 0x1d8   : > { %v2246_v47 = vadd.f32 %v2245_v45, %v2086_v37  ;;  %v2247_v53 = vpop.f32.mrb[105].mxu0 }
 0x1d9   : > { %v2248_v61 = vadd.f32 %v2247_v53, %v2086_v37  ;;  %v2249_v63 = vpop.f32.mrb[106].mxu0  ;;  %2418 = vmatprep.subr.bf16.mxu1 %v2355_v39 }
 0x1da   : > { %v2250_v46 = vadd.f32 %v2249_v63, %v2091_v54  ;;  %v2251_v48 = vpop.f32.mrb[107].mxu0  ;;  %2419 = vmatpush1.bf16.msra.mxu1 %v2354_v30  ;;  %v2312_v50 = vmax.f32 %v2246_v47, 0.0 }
 0x1db   : > { %v2252_v49 = vadd.f32 %v2251_v48, %v2091_v54  ;;  %v2313_v52 = vmax.f32 %v2248_v61, 0.0  ;;  %v2126_v54 = vpop.permute.xlu0 %2125  ;;  %v2131_v48 = vpop.permute.xlu1 %2130 }
 0x1dc   : > { %v2314_v51 = vmax.f32 %v2250_v46, 0.0 }
 0x1dd   : > { %v2315_v55 = vmax.f32 %v2252_v49, 0.0  ;;  %1939 = vmatmul.mubr.bf16.gmra.mrb[8].mxu1 %v3074_v3 }
 0x1de   : > { %v2356_v56 = vpack.c.bf16 %v2314_v51, %v2312_v50  ;;  %1948 = vmatprep.mubr.bf16.mxu1 %v3144_v2  ;;  %v3078_v51 = vld [vmem:[%s3893_s3 + $0xc8] ss:$16 sps:$4 sm:$0xff]  }
 0x1df   : > { %v2357_v58 = vpack.c.bf16 %v2315_v55, %v2313_v52  ;;  %v2255_v59 = vpop.f32.mrb[108].mxu0 }
 0x1e0   : > { %v2256_v60 = vadd.f32 %v2255_v59, %v2096_v57  ;;  %v2257_v62 = vpop.f32.mrb[109].mxu0 }
 0x1e1   : > { %v2258_v1 = vadd.f32 %v2257_v62, %v2096_v57  ;;  %v2259_v4 = vpop.f32.mrb[110].mxu0  ;;  %2420 = vmatprep.subr.bf16.mxu1 %v2357_v58 }
 0x1e2   : > { %v2260_v6 = vadd.f32 %v2259_v4, %v2101_v0  ;;  %v2261_v7 = vpop.f32.mrb[111].mxu0  ;;  %2421 = vmatpush1.bf16.msra.mxu1 %v2356_v56  ;;  %v2316_v9 = vmax.f32 %v2256_v60, 0.0 }
 0x1e3   : > { %v2262_v8 = vadd.f32 %v2261_v7, %v2101_v0  ;;  %v2317_v12 = vmax.f32 %v2258_v1, 0.0  ;;  %v2136_v0 = vpop.permute.xlu0 %2135  ;;  %v2141_v7 = vpop.permute.xlu1 %2140 }
 0x1e4   : > { %v2318_v11 = vmax.f32 %v2260_v6, 0.0 }
 0x1e5   : > { %v2319_v13 = vmax.f32 %v2262_v8, 0.0  ;;  %1949 = vmatmul.mubr.bf16.gmra.mrb[12].mxu1 %v3075_v5 }
 0x1e6   : > { %v2358_v16 = vpack.c.bf16 %v2318_v11, %v2316_v9  ;;  %1958 = vmatprep.mubr.bf16.mxu1 %v3144_v2  ;;  %v3079_v11 = vld [vmem:[%s3893_s3 + $0xe8] ss:$16 sps:$4 sm:$0xff]  }
 0x1e7   : > { %v2359_v18 = vpack.c.bf16 %v2319_v13, %v2317_v12  ;;  %v2265_v19 = vpop.f32.mrb[112].mxu0 }
 0x1e8   : > { %v2266_v21 = vadd.f32 %v2265_v19, %v2106_v17  ;;  %v2267_v23 = vpop.f32.mrb[113].mxu0 }
 0x1e9   : > { %v2268_v25 = vadd.f32 %v2267_v23, %v2106_v17  ;;  %v2269_v26 = vpop.f32.mrb[114].mxu0  ;;  %2422 = vmatprep.subr.bf16.mxu1 %v2359_v18 }
 0x1ea   : > { %v2270_v29 = vadd.f32 %v2269_v26, %v2111_v24  ;;  %v2271_v31 = vpop.f32.mrb[115].mxu0  ;;  %2423 = vmatpush1.bf16.msra.mxu1 %v2358_v16  ;;  %v2320_v32 = vmax.f32 %v2266_v21, 0.0  ;;  %v3081_v26 = vld [vmem:[%s3893_s3 + $0x2c] ss:$16 sps:$4 sm:$0xff]  }
 0x1eb   : > { %v2272_v10 = vadd.f32 %v2271_v31, %v2111_v24  ;;  %v2321_v34 = vmax.f32 %v2268_v25, 0.0  ;;  %v3080_v25 = vld [vmem:[%s3893_s3 + $0xc] ss:$16 sps:$4 sm:$0xff]  }
 0x1ec   : > { %v2322_v33 = vmax.f32 %v2270_v29, 0.0  ;;  %v3083_v29 = vld [vmem:[%s3893_s3 + $0x6c] ss:$16 sps:$4 sm:$0xff]  }
 0x1ed   : > { %v2323_v35 = vmax.f32 %v2272_v10, 0.0  ;;  %1959 = vmatmul.mubr.bf16.gmra.mrb[16].mxu1 %v3076_v27  ;;  %v3082_v27 = vld [vmem:[%s3893_s3 + $0x4c] ss:$16 sps:$4 sm:$0xff]  }
 0x1ee   : > { %v2360_v36 = vpack.c.bf16 %v2322_v33, %v2320_v32  ;;  %1968 = vmatprep.mubr.bf16.mxu1 %v3144_v2  ;;  %v3084_v31 = vld [vmem:[%s3893_s3 + $0x8c] ss:$16 sps:$4 sm:$0xff]  }
 0x1ef   : > { %v2361_v40 = vpack.c.bf16 %v2323_v35, %v2321_v34  ;;  %v2275_v41 = vpop.f32.mrb[116].mxu0  ;;  %v3085_v10 = vld [vmem:[%s3893_s3 + $0xac] ss:$16 sps:$4 sm:$0xff]   ;;  %v332_v34 = vpop.permute.xlu0 %331  ;;  %v3088_v35 = vld [vmem:[%s3215_s8] sm:$0xff] }
 0x1f0   : > { %v2276_v42 = vadd.f32 %v2275_v41, %v2116_v38  ;;  %v2277_v43 = vpop.f32.mrb[117].mxu0  ;;  %v3086_v32 = vld [vmem:[%s3893_s3 + $0xcc] ss:$16 sps:$4 sm:$0xff]   ;;  %v337_v41 = vpop.permute.xlu1 %336 }
 0x1f1   : > { %v2278_v14 = vadd.f32 %v2277_v43, %v2116_v38  ;;  %v2279_v15 = vpop.f32.mrb[118].mxu0  ;;  %2424 = vmatprep.subr.bf16.mxu1 %v2361_v40  ;;  %v3087_v33 = vld [vmem:[%s3893_s3 + $0xec] ss:$16 sps:$4 sm:$0xff]   ;;  %v3090_v43 = vld [vmem:[%s3215_s8 + $0x10] sm:$0xff] }
 0x1f2   : > { %v2280_v22 = vadd.f32 %v2279_v15, %v2121_v44  ;;  %v2281_v28 = vpop.f32.mrb[119].mxu0  ;;  %2425 = vmatpush1.bf16.msra.mxu1 %v2360_v36  ;;  %v2324_v37 = vmax.f32 %v2276_v42, 0.0  ;;  %v409_v36 = vadd.f32 %v3088_v35, %v332_v34  ;;  %v3089_v38 = vld [vmem:[%s3215_s8 + $0x8] sm:$0xff] }
 0x1f3   : > { %v2282_v30 = vadd.f32 %v2281_v28, %v2121_v44  ;;  %v2325_v45 = vmax.f32 %v2278_v14, 0.0  ;;  %v410_v40 = vadd.f32 %v3089_v38, %v332_v34  ;;  %v411_v44 = vadd.f32 %v3090_v43, %v337_v41  ;;  %v3102_v38 = vld [vmem:[%s3215_s8 + $0x70] sm:$0xff]  ;;  %v3103_v43 = vld [vmem:[%s3215_s8 + $0x78] sm:$0xff] }
 0x1f4   : > { %v2326_v39 = vmax.f32 %v2280_v22, 0.0 }
 0x1f5   : > { %v2327_v47 = vmax.f32 %v2282_v30, 0.0  ;;  %1969 = vmatmul.mubr.bf16.gmra.mrb[20].mxu1 %v3077_v20 }
 0x1f6   : > { %v2362_v53 = vpack.c.bf16 %v2326_v39, %v2324_v37  ;;  %1978 = vmatprep.mubr.bf16.mxu1 %v3144_v2 }
 0x1f7   : > { %v2363_v61 = vpack.c.bf16 %v2327_v47, %v2325_v45  ;;  %v2285_v63 = vpop.f32.mrb[120].mxu0  ;;  %v342_v47 = vpop.permute.xlu0 %341 }
 0x1f8   : > { %v2286_v3 = vadd.f32 %v2285_v63, %v2126_v54  ;;  %v2287_v46 = vpop.f32.mrb[121].mxu0  ;;  %v3093_v63 = vld [vmem:[%s3215_s8 + $0x28] sm:$0xff] }
 0x1f9   : > { %v2288_v49 = vadd.f32 %v2287_v46, %v2126_v54  ;;  %v2289_v50 = vpop.f32.mrb[122].mxu0  ;;  %2426 = vmatprep.subr.bf16.mxu1 %v2363_v61  ;;  %v3092_v54 = vld [vmem:[%s3215_s8 + $0x20] sm:$0xff]  ;;  %v347_v46 = vpop.permute.xlu1 %346 }
 0x1fa   : > { %v2290_v52 = vadd.f32 %v2289_v50, %v2131_v48  ;;  %v2291_v55 = vpop.f32.mrb[123].mxu0  ;;  %2427 = vmatpush1.bf16.msra.mxu1 %v2362_v53  ;;  %v2328_v57 = vmax.f32 %v2286_v3, 0.0  ;;  %v413_v61 = vadd.f32 %v3092_v54, %v342_v47  ;;  %v414_v3 = vadd.f32 %v3093_v63, %v342_v47  ;;  %v3105_v47 = vld [vmem:[%s3215_s8 + $0x88] sm:$0xff]  ;;  %v3106_v63 = vld [vmem:[%s3215_s8 + $0x90] sm:$0xff] }
 0x1fb   : > { %v2292_v56 = vadd.f32 %v2291_v55, %v2131_v48  ;;  %v2329_v59 = vmax.f32 %v2288_v49, 0.0  ;;  %v3094_v49 = vld [vmem:[%s3215_s8 + $0x30] sm:$0xff]  ;;  %v3095_v55 = vld [vmem:[%s3215_s8 + $0x38] sm:$0xff] }
 0x1fc   : > { %v2330_v58 = vmax.f32 %v2290_v52, 0.0  ;;  %v415_v50 = vadd.f32 %v3094_v49, %v347_v46  ;;  %v3107_v49 = vld [vmem:[%s3215_s8 + $0x98] sm:$0xff] }
 0x1fd   : > { %v2331_v60 = vmax.f32 %v2292_v56, 0.0  ;;  %1979 = vmatmul.mubr.bf16.gmra.mrb[24].mxu1 %v3078_v51  ;;  %v416_v56 = vadd.f32 %v3095_v55, %v347_v46 }
 0x1fe   : > { %v2364_v62 = vpack.c.bf16 %v2330_v58, %v2328_v57  ;;  %1988 = vmatprep.mubr.bf16.mxu1 %v3144_v2 }
 0x1ff   : > { %v2365_v1 = vpack.c.bf16 %v2331_v60, %v2329_v59  ;;  %v2295_v4 = vpop.f32.mrb[124].mxu0 }
 0x200   : > { %v2296_v5 = vadd.f32 %v2295_v4, %v2136_v0  ;;  %v2297_v6 = vpop.f32.mrb[125].mxu0 }
 0x201   : > { %v2298_v8 = vadd.f32 %v2297_v6, %v2136_v0  ;;  %v2299_v9 = vpop.f32.mrb[126].mxu0  ;;  %2428 = vmatprep.subr.bf16.mxu1 %v2365_v1  ;;  %v352_v1 = vpop.permute.xlu0 %351 }
 0x202   : > { %v2300_v12 = vadd.f32 %v2299_v9, %v2141_v7  ;;  %v2301_v13 = vpop.f32.mrb[127].mxu0  ;;  %2429 = vmatpush1.bf16.msra.mxu1 %v2364_v62  ;;  %v2332_v17 = vmax.f32 %v2296_v5, 0.0  ;;  %v3096_v5 = vld [vmem:[%s3215_s8 + $0x40] sm:$0xff]  ;;  %v357_v9 = vpop.permute.xlu1 %356 }
 0x203   : > { %v2302_v16 = vadd.f32 %v2301_v13, %v2141_v7  ;;  %v2333_v19 = vmax.f32 %v2298_v8, 0.0  ;;  %v417_v6 = vadd.f32 %v3096_v5, %v352_v1  ;;  %v3097_v7 = vld [vmem:[%s3215_s8 + $0x48] sm:$0xff] }
 0x204   : > { %v2334_v18 = vmax.f32 %v2300_v12, 0.0  ;;  %v418_v8 = vadd.f32 %v3097_v7, %v352_v1  ;;  %v3098_v12 = vld [vmem:[%s3215_s8 + $0x50] sm:$0xff]  ;;  %v3109_v1 = vld [vmem:[%s3215_s8 + $0xa8] sm:$0xff] }
 0x205   : > { %v2335_v21 = vmax.f32 %v2302_v16, 0.0  ;;  %1989 = vmatmul.mubr.bf16.gmra.mrb[28].mxu1 %v3079_v11  ;;  %v419_v13 = vadd.f32 %v3098_v12, %v357_v9  ;;  %v3110_v7 = vld [vmem:[%s3215_s8 + $0xb0] sm:$0xff]  ;;  %v3111_v12 = vld [vmem:[%s3215_s8 + $0xb8] sm:$0xff] }
 0x206   : > { %v2366_v23 = vpack.c.bf16 %v2334_v18, %v2332_v17  ;;  %2448 = vmatprep.mubr.bf16.mxu1 %v3144_v2  ;;  %v3099_v18 = vld [vmem:[%s3215_s8 + $0x58] sm:$0xff]  ;;  %v367_v35 = vpop.permute.xlu1 %366 }
 0x207   : > { %v2367_v24 = vpack.c.bf16 %v2335_v21, %v2333_v19  ;;  %v420_v19 = vadd.f32 %v3099_v18, %v357_v9 }
 0x209   : > { %2430 = vmatprep.subr.bf16.mxu1 %v2367_v24 }
 0x20a   : > { %2431 = vmatpush1.bf16.msra.mxu1 %v2366_v23  ;;  %v377_v54 = vpop.permute.xlu1 %376 }
 0x20d   : > { %2449 = vmatmul.mubr.bf16.vlgmr.msra.gmra.mrb[0].mxu1 %v3080_v25 }
 0x20e   : > { %2458 = vmatprep.mubr.bf16.mxu1 %v3144_v2  ;;  %v387_v5 = vpop.permute.xlu1 %386 }
 0x215   : > { %2459 = vmatmul.mubr.bf16.gmra.mrb[4].mxu1 %v3081_v26 }
 0x216   : > { %2468 = vmatprep.mubr.bf16.mxu1 %v3144_v2 }
 0x21d   : > { %2469 = vmatmul.mubr.bf16.gmra.mrb[8].mxu1 %v3082_v27 }
 0x21e   : > { %2478 = vmatprep.mubr.bf16.mxu1 %v3144_v2 }
 0x225   : > { %2479 = vmatmul.mubr.bf16.gmra.mrb[12].mxu1 %v3083_v29  ;;  %v362_v29 = vpop.permute.xlu0 %361 }
 0x226   : > { %2488 = vmatprep.mubr.bf16.mxu1 %v3144_v2 }
 0x22d   : > { %2489 = vmatmul.mubr.bf16.gmra.mrb[16].mxu1 %v3084_v31 }
 0x22e   : > { %2498 = vmatprep.mubr.bf16.mxu1 %v3144_v2 }
 0x235   : > { %2499 = vmatmul.mubr.bf16.gmra.mrb[20].mxu1 %v3085_v10  ;;  %v3100_v10 = vld [vmem:[%s3215_s8 + $0x60] sm:$0xff] }
 0x236   : > { %2508 = vmatprep.mubr.bf16.mxu1 %v3144_v2 }
 0x23d   : > { %2509 = vmatmul.mubr.bf16.gmra.mrb[24].mxu1 %v3086_v32  ;;  %v421_v32 = vadd.f32 %v3100_v10, %v362_v29  ;;  %v397_v10 = vpop.permute.xlu1 %396 }
 0x23e   : > { %2518 = vmatprep.mubr.bf16.mxu1 %v3144_v2  ;;  %v3091_v2 = vld [vmem:[%s3215_s8 + $0x18] sm:$0xff] }
 0x23f   : > { %v412_v20 = vadd.f32 %v3091_v2, %v337_v41 }
 0x245   : > { %2519 = vmatmul.mubr.bf16.gmra.mrb[28].mxu1 %v3087_v33  ;;  %v3101_v33 = vld [vmem:[%s3215_s8 + $0x68] sm:$0xff] }
 0x246   : > { %v422_v34 = vadd.f32 %v3101_v33, %v362_v29  ;;  %v3113_v29 = vld [vmem:[%s3215_s8 + $0xc8] sm:$0xff]  ;;  %v3114_v33 = vld [vmem:[%s3215_s8 + $0xd0] sm:$0xff] }
 0x2e0   : > { %v2450_v42 = vpop.f32.mrb[0].mxu1 }
 0x2e1   : > { %v2869_v14 = vadd.f32 %v2450_v42, %v409_v36  ;;  %v2452_v15 = vpop.f32.mrb[1].mxu1 }
 0x2e2   : > { %v2870_v22 = vadd.f32 %v2452_v15, %v410_v40  ;;  %v2454_v28 = vpop.f32.mrb[2].mxu1  ;;  %v423_v40 = vadd.f32 %v3102_v38, %v367_v35  ;;  %v3115_v38 = vld [vmem:[%s3215_s8 + $0xd8] sm:$0xff] }
 0x2e3   : > { %v2871_v30 = vadd.f32 %v2454_v28, %v411_v44  ;;  %v2456_v37 = vpop.f32.mrb[3].mxu1  ;;  %v424_v44 = vadd.f32 %v3103_v43, %v367_v35 }
 0x2e4   : > { %v2853_v39 = vpack.c.bf16 %v2870_v22, %v2869_v14  ;;  %v2872_v45 = vadd.f32 %v2456_v37, %v412_v20 }
 0x2e6   : > { %2657 = vst [vmem:[%s3835_s12] sm:$0xff] %v2853_v39  ;;  %v2854_v53 = vpack.c.bf16 %v2872_v45, %v2871_v30  ;;  %v372_v30 = vpop.permute.xlu0 %371  ;;  %v3104_v39 = vld [vmem:[%s3215_s8 + $0x80] sm:$0xff] }
 0x2e7   : > { %v425_v45 = vadd.f32 %v3104_v39, %v372_v30 }
 0x2e8   : > { %2658 = vst [vmem:[%s3835_s12 + $0x8] sm:$0xff] %v2854_v53  ;;  %v2460_v48 = vpop.f32.mrb[4].mxu1  ;;  %v426_v53 = vadd.f32 %v3105_v47, %v372_v30  ;;  %v3118_v47 = vld [vmem:[%s3215_s8 + $0xf0] sm:$0xff] }
 0x2e9   : > { %v2873_v51 = vadd.f32 %v2460_v48, %v413_v61  ;;  %v2462_v52 = vpop.f32.mrb[5].mxu1 }
 0x2ea   : > { %v2874_v57 = vadd.f32 %v2462_v52, %v414_v3  ;;  %v2464_v58 = vpop.f32.mrb[6].mxu1  ;;  %v427_v3 = vadd.f32 %v3106_v63, %v377_v54  ;;  %v3119_v63 = vld [vmem:[%s3215_s8 + $0xf8] sm:$0xff] }
 0x2eb   : > { %v2875_v59 = vadd.f32 %v2464_v58, %v415_v50  ;;  %v2466_v60 = vpop.f32.mrb[7].mxu1  ;;  %v428_v50 = vadd.f32 %v3107_v49, %v377_v54 }
 0x2ec   : > { %v2855_v62 = vpack.c.bf16 %v2874_v57, %v2873_v51  ;;  %v2876_v0 = vadd.f32 %v2466_v60, %v416_v56 }
 0x2ee   : > { %2659 = vst [vmem:[%s3835_s12 + $0x10] sm:$0xff] %v2855_v62  ;;  %v2856_v4 = vpack.c.bf16 %v2876_v0, %v2875_v59  ;;  %v382_v59 = vpop.permute.xlu0 %381  ;;  %v3108_v62 = vld [vmem:[%s3215_s8 + $0xa0] sm:$0xff] }
 0x2ef   : > { %v429_v0 = vadd.f32 %v3108_v62, %v382_v59 }
 0x2f0   : > { %2660 = vst [vmem:[%s3835_s12 + $0x18] sm:$0xff] %v2856_v4  ;;  %v2470_v11 = vpop.f32.mrb[8].mxu1  ;;  %v430_v4 = vadd.f32 %v3109_v1, %v382_v59 }
 0x2f1   : > { %v2877_v16 = vadd.f32 %v2470_v11, %v417_v6  ;;  %v2472_v17 = vpop.f32.mrb[9].mxu1 }
 0x2f2   : > { %v2878_v21 = vadd.f32 %v2472_v17, %v418_v8  ;;  %v2474_v23 = vpop.f32.mrb[10].mxu1  ;;  %v431_v8 = vadd.f32 %v3110_v7, %v387_v5 }
 0x2f3   : > { %v2879_v24 = vadd.f32 %v2474_v23, %v419_v13  ;;  %v2476_v25 = vpop.f32.mrb[11].mxu1  ;;  %v432_v13 = vadd.f32 %v3111_v12, %v387_v5 }
 0x2f4   : > { %v2857_v26 = vpack.c.bf16 %v2878_v21, %v2877_v16  ;;  %v2880_v27 = vadd.f32 %v2476_v25, %v420_v19  ;;  %v392_v21 = vpop.permute.xlu0 %391 }
 0x2f6   : > { %2661 = vst [vmem:[%s3835_s12 + $0x20] sm:$0xff] %v2857_v26  ;;  %v2858_v31 = vpack.c.bf16 %v2880_v27, %v2879_v24  ;;  %v3112_v26 = vld [vmem:[%s3215_s8 + $0xc0] sm:$0xff] }
 0x2f7   : > { %v433_v27 = vadd.f32 %v3112_v26, %v392_v21 }
 0x2f8   : > { %2662 = vst [vmem:[%s3835_s12 + $0x28] sm:$0xff] %v2858_v31  ;;  %v2480_v36 = vpop.f32.mrb[12].mxu1  ;;  %v434_v31 = vadd.f32 %v3113_v29, %v392_v21 }
 0x2f9   : > { %v2881_v41 = vadd.f32 %v2480_v36, %v421_v32  ;;  %v2482_v42 = vpop.f32.mrb[13].mxu1 }
 0x2fa   : > { %v2882_v14 = vadd.f32 %v2482_v42, %v422_v34  ;;  %v2484_v15 = vpop.f32.mrb[14].mxu1  ;;  %v435_v34 = vadd.f32 %v3114_v33, %v397_v10 }
 0x2fb   : > { %v2883_v2 = vadd.f32 %v2484_v15, %v423_v40  ;;  %v2486_v20 = vpop.f32.mrb[15].mxu1  ;;  %v436_v40 = vadd.f32 %v3115_v38, %v397_v10 }
 0x2fc   : > { %v2859_v22 = vpack.c.bf16 %v2882_v14, %v2881_v41  ;;  %v2884_v28 = vadd.f32 %v2486_v20, %v424_v44  ;;  %v402_v14 = vpop.permute.xlu0 %401  ;;  %v407_v20 = vpop.permute.xlu1 %406 }
 0x2fe   : > { %2663 = vst [vmem:[%s3835_s12 + $0x30] sm:$0xff] %v2859_v22  ;;  %v2860_v37 = vpack.c.bf16 %v2884_v28, %v2883_v2  ;;  %v3116_v28 = vld [vmem:[%s3215_s8 + $0xe0] sm:$0xff] }
 0x2ff   : > { %v437_v30 = vadd.f32 %v3116_v28, %v402_v14 }
 0x300   : > { %2664 = vst [vmem:[%s3835_s12 + $0x38] sm:$0xff] %v2860_v37  ;;  %v2490_v61 = vpop.f32.mrb[16].mxu1  ;;  %v3117_v37 = vld [vmem:[%s3215_s8 + $0xe8] sm:$0xff] }
 0x301   : > { %v2885_v46 = vadd.f32 %v2490_v61, %v425_v45  ;;  %v2492_v48 = vpop.f32.mrb[17].mxu1  ;;  %v438_v39 = vadd.f32 %v3117_v37, %v402_v14 }
 0x302   : > { %v2886_v51 = vadd.f32 %v2492_v48, %v426_v53  ;;  %v2494_v52 = vpop.f32.mrb[18].mxu1  ;;  %v439_v53 = vadd.f32 %v3118_v47, %v407_v20 }
 0x303   : > { %v2887_v55 = vadd.f32 %v2494_v52, %v427_v3  ;;  %v2496_v56 = vpop.f32.mrb[19].mxu1  ;;  %v440_v3 = vadd.f32 %v3119_v63, %v407_v20 }
 0x304   : > { %v2861_v57 = vpack.c.bf16 %v2886_v51, %v2885_v46  ;;  %v2888_v58 = vadd.f32 %v2496_v56, %v428_v50 }
 0x306   : > { %2665 = vst [vmem:[%s3835_s12 + $0x40] sm:$0xff] %v2861_v57  ;;  %v2862_v60 = vpack.c.bf16 %v2888_v58, %v2887_v55 }
 0x308   : > { %2666 = vst [vmem:[%s3835_s12 + $0x48] sm:$0xff] %v2862_v60  ;;  %v2500_v6 = vpop.f32.mrb[20].mxu1 }
 0x309   : > { %v2889_v9 = vadd.f32 %v2500_v6, %v429_v0  ;;  %v2502_v11 = vpop.f32.mrb[21].mxu1 }
 0x30a   : > { %v2890_v16 = vadd.f32 %v2502_v11, %v430_v4  ;;  %v2504_v17 = vpop.f32.mrb[22].mxu1 }
 0x30b   : > { %v2891_v18 = vadd.f32 %v2504_v17, %v431_v8  ;;  %v2506_v19 = vpop.f32.mrb[23].mxu1 }
 0x30c   : > { %v2863_v23 = vpack.c.bf16 %v2890_v16, %v2889_v9  ;;  %v2892_v24 = vadd.f32 %v2506_v19, %v432_v13 }
 0x30e   : > { %2667 = vst [vmem:[%s3835_s12 + $0x50] sm:$0xff] %v2863_v23  ;;  %v2864_v25 = vpack.c.bf16 %v2892_v24, %v2891_v18 }
 0x310   : > { %2668 = vst [vmem:[%s3835_s12 + $0x58] sm:$0xff] %v2864_v25  ;;  %v2510_v32 = vpop.f32.mrb[24].mxu1 }
 0x311   : > { %v2893_v35 = vadd.f32 %v2510_v32, %v433_v27  ;;  %v2512_v36 = vpop.f32.mrb[25].mxu1 }
 0x312   : > { %v2894_v41 = vadd.f32 %v2512_v36, %v434_v31  ;;  %v2514_v42 = vpop.f32.mrb[26].mxu1 }
 0x313   : > { %v2895_v43 = vadd.f32 %v2514_v42, %v435_v34  ;;  %v2516_v44 = vpop.f32.mrb[27].mxu1 }
 0x314   : > { %v2865_v15 = vpack.c.bf16 %v2894_v41, %v2893_v35  ;;  %v2896_v2 = vadd.f32 %v2516_v44, %v436_v40 }
 0x316   : > { %2669 = vst [vmem:[%s3835_s12 + $0x60] sm:$0xff] %v2865_v15  ;;  %v2866_v22 = vpack.c.bf16 %v2896_v2, %v2895_v43 }
 0x318   : > { %2670 = vst [vmem:[%s3835_s12 + $0x68] sm:$0xff] %v2866_v22  ;;  %v2520_v45 = vpop.f32.mrb[28].mxu1 }
 0x319   : > { %v2897_v54 = vadd.f32 %v2520_v45, %v437_v30  ;;  %v2522_v61 = vpop.f32.mrb[29].mxu1 }
 0x31a   : > { %v2898_v46 = vadd.f32 %v2522_v61, %v438_v39  ;;  %v2524_v48 = vpop.f32.mrb[30].mxu1 }
 0x31b   : > { %v2899_v49 = vadd.f32 %v2524_v48, %v439_v53  ;;  %v2526_v50 = vpop.f32.mrb[31].mxu1 }
 0x31c   : > { %v2867_v51 = vpack.c.bf16 %v2898_v46, %v2897_v54  ;;  %v2900_v52 = vadd.f32 %v2526_v50, %v440_v3 }
 0x31e   : > { %2671 = vst [vmem:[%s3835_s12 + $0x70] sm:$0xff] %v2867_v51  ;;  %v2868_v55 = vpack.c.bf16 %v2900_v52, %v2899_v49 }
 0x320   : > { %2672 = vst [vmem:[%s3835_s12 + $0x78] sm:$0xff] %v2868_v55 }
 0x321 PF: > { %s15_s20 = sadd.s32 1, %s3142_s20   ;;  %s3896_s18 = smov %s3138_s19 }
 0x322   : > { %p12_p5 = scmp.ge.s32.totalorder %s15_s20, 4   ;;  %s3897_s19 = smov %s3899_s21 }
 0x324   :  { %14 = sbr.rel (!%p12_p5) target bundleno = 2 (0x2), region = 70 }

</bundles_post_ra>
